<compile_context>
chip_gen: v5e
topology: v5e:2x2
jax: 0.10.0
libtpu: 0.0.40
codegen_flags: <defaults>
</compile_context>

<pallas_src>
import jax
import jax.numpy as jnp
from jax import lax
from jax.experimental import pallas as pl
from jax.experimental.pallas import tpu as pltpu
from jax.scipy.special import gammaln

_EPS = 1e-07
_NEG_BIG = -1e9   # bias of the padded column -> exp() == 0 exactly after softmax


def _bezier_kernel(x_ref, wlin_ref, blin_ref, logbin_ref, cp_ref, w_ref,
                   dp_ref, pv_ref, intvls_ref):
    # Per batch tile TB:
    #   x_ref      (TB, IN)     input features
    #   wlin_ref   (DP, IN)     linear weight, PyTorch (out, in) layout, row 0 zeros
    #   blin_ref   (1, DP)      linear bias, col 0 = -1e9
    #   logbin_ref (CP, 1)      log C(CP-1, k) with the module's eps convention
    #   cp_ref     (TB, D, CP)  control points
    #   w_ref      (TB, 1, CP)  rational-Bezier weights
    #   dp_ref     (TB, D, DP)  output data points
    #   pv_ref     (TB, 1, DP)  output parameter variable
    #   intvls_ref (TB, DP)     output intervals
    cp_n = logbin_ref.shape[0]
    dp_n = blin_ref.shape[1]

    # ---- intervals: Linear -> Softmax (left zero-pad folded into column 0) ----
    z = lax.dot_general(x_ref[...], wlin_ref[...],
                        dimension_numbers=(((1,), (1,)), ((), ())),
                        precision=lax.Precision.HIGHEST,
                        preferred_element_type=jnp.float32)        # (TB, DP)
    z = z + blin_ref[...]
    z = z - jnp.max(z, axis=-1, keepdims=True)
    e = jnp.exp(z)
    intvls = e / jnp.sum(e, axis=-1, keepdims=True)                # col 0 == 0
    intvls_ref[...] = intvls.astype(intvls_ref.dtype)

    # ---- pv = clamp(cumsum(intvls, -1), 0, 1): exact f32 prefix sum ----------
    s_idx = lax.broadcasted_iota(jnp.int32, (1, dp_n, dp_n), 1)    # source index
    t_idx = lax.broadcasted_iota(jnp.int32, (1, dp_n, dp_n), 2)    # target index
    contrib = jnp.where(s_idx <= t_idx, intvls[:, :, None], 0.0)   # (TB, DP, DP)
    pv = jnp.clip(jnp.sum(contrib, axis=1), 0.0, 1.0)              # (TB, DP)
    pv_ref[...] = pv[:, None, :].astype(pv_ref.dtype)

    # ---- Bernstein basis: bs[b,k,t] = C(CP-1,k) pv^k (1-pv)^(CP-1-k) ---------
    log_pv = jnp.log(pv + _EPS)[:, None, :]                        # (TB, 1, DP)
    log_1mpv = jnp.log(1.0 - pv + _EPS)[:, None, :]                # (TB, 1, DP)
    k = lax.broadcasted_iota(jnp.int32, (1, cp_n, 1), 1).astype(jnp.float32)
    kc = jnp.float32(cp_n - 1) - k
    lbs = k * log_pv + kc * log_1mpv + logbin_ref[...][None, :, :]
    bs = jnp.exp(lbs)                                              # (TB, CP, DP)

    # ---- rational Bezier: dp = ((cp * w) @ bs) / (w @ bs) --------------------
    cpw = cp_ref[...] * w_ref[...]                                 # (TB, D, CP)
    num = jnp.einsum('bdk,bkt->bdt', cpw, bs,
                     precision=lax.Precision.HIGHEST,
                     preferred_element_type=jnp.float32)           # (TB, D, DP)
    den = jnp.einsum('bok,bkt->bot', w_ref[...], bs,
                     precision=lax.Precision.HIGHEST,
                     preferred_element_type=jnp.float32)           # (TB, 1, DP)
    dp_ref[...] = (num / den).astype(dp_ref.dtype)


def bezier_layer_forward(x, control_points, weights, lin_weight, lin_bias,
                         *, tile_b=64):
    """BezierLayer forward.

    x              : (N, IN) float32
    control_points : (N, D, CP)
    weights        : (N, 1, CP)
    lin_weight     : (DP-1, IN)  generate_intervals Linear weight (PyTorch layout)
    lin_bias       : (DP-1,)     generate_intervals Linear bias
    Returns (dp (N, D, DP), pv (N, 1, DP), intvls (N, DP)).
    """
    n, in_features = x.shape
    _, d, cp_n = control_points.shape
    dp_n = lin_weight.shape[0] + 1

    # _check_consistency (host-side asserts)
    assert control_points.shape == (n, d, cp_n), 'control points inconsistent'
    assert weights.shape == (n, 1, cp_n), \
        'There should be only one weight corresponding to each control point.'
    assert lin_weight.shape[1] == in_features and lin_bias.shape == (dp_n - 1,)

    # Glue: fold ConstantPad1d([1, 0], 0) into the linear/softmax.
    w_pad = jnp.concatenate(
        [jnp.zeros((1, in_features), lin_weight.dtype), lin_weight], axis=0)
    b_pad = jnp.concatenate(
        [jnp.full((1,), _NEG_BIG, lin_bias.dtype), lin_bias], axis=0
    ).reshape(1, dp_n)

    # log C(CP-1, k) with the module's eps-in-lgamma convention (constants).
    kk = jnp.arange(cp_n, dtype=jnp.float32)
    log_binom = (gammaln(jnp.float32(cp_n) + _EPS)
                 - gammaln(kk + 1.0 + _EPS)
                 - gammaln(jnp.float32(cp_n) - 1.0 - kk + 1.0 + _EPS)
                 ).reshape(cp_n, 1).astype(jnp.float32)

    tb = n if n <= tile_b else tile_b
    assert tb == n or tb % 8 == 0, 'tile_b must be a multiple of 8'
    pad = (-n) % tb
    if pad:
        x = jnp.pad(x, ((0, pad), (0, 0)))
        control_points = jnp.pad(control_points, ((0, pad), (0, 0), (0, 0)))
        # pad weights with ones so the padded rows keep a nonzero denominator
        weights = jnp.pad(weights, ((0, pad), (0, 0), (0, 0)), constant_values=1.0)
    n_pad = n + pad

    dp, pv, intvls = pl.pallas_call(
        _bezier_kernel,
        out_shape=(
            jax.ShapeDtypeStruct((n_pad, d, dp_n), x.dtype),
            jax.ShapeDtypeStruct((n_pad, 1, dp_n), x.dtype),
            jax.ShapeDtypeStruct((n_pad, dp_n), x.dtype),
        ),
        grid_spec=pltpu.PrefetchScalarGridSpec(
            num_scalar_prefetch=0,
            grid=(n_pad // tb,),
            in_specs=[
                pl.BlockSpec((tb, in_features), lambda i: (i, 0)),    # x (batch tiled)
                pl.BlockSpec((dp_n, in_features), lambda i: (0, 0)),  # linear W (resident)
                pl.BlockSpec((1, dp_n), lambda i: (0, 0)),            # linear b (resident)
                pl.BlockSpec((cp_n, 1), lambda i: (0, 0)),            # log binomials
                pl.BlockSpec((tb, d, cp_n), lambda i: (i, 0, 0)),     # control points
                pl.BlockSpec((tb, 1, cp_n), lambda i: (i, 0, 0)),     # weights
            ],
            out_specs=[
                pl.BlockSpec((tb, d, dp_n), lambda i: (i, 0, 0)),     # dp
                pl.BlockSpec((tb, 1, dp_n), lambda i: (i, 0, 0)),     # pv
                pl.BlockSpec((tb, dp_n), lambda i: (i, 0)),           # intvls
            ],
        ),
        compiler_params=pltpu.CompilerParams(
            dimension_semantics=("parallel",),  # batch tiles are independent
        ),
    )(x, w_pad, b_pad, log_binom, control_points, weights)

    if pad:
        dp, pv, intvls = dp[:n], pv[:n], intvls[:n]
    return dp, pv, intvls


def _reference(x, control_points, weights, lin_weight, lin_bias):
    """Faithful JAX port of the PyTorch BezierLayer.forward (for checking)."""
    n = x.shape[0]
    cp_n = control_points.shape[-1]
    z = jnp.dot(x, lin_weight.T, precision=lax.Precision.HIGHEST) + lin_bias
    s = jax.nn.softmax(z, axis=1)
    intvls = jnp.concatenate([jnp.zeros((n, 1), s.dtype), s], axis=1)
    pv = jnp.clip(jnp.cumsum(intvls, axis=-1), 0.0, 1.0)[:, None, :]
    pw1 = jnp.arange(cp_n, dtype=jnp.float32).reshape(1, -1, 1)
    pw2 = jnp.flip(pw1, axis=1)
    lbs = (pw1 * jnp.log(pv + _EPS) + pw2 * jnp.log(1.0 - pv + _EPS)
           + gammaln(jnp.float32(cp_n) + _EPS)
           - gammaln(pw1 + 1.0 + _EPS) - gammaln(pw2 + 1.0 + _EPS))
    bs = jnp.exp(lbs)
    num = jnp.einsum('bdk,bkt->bdt', control_points * weights, bs,
                     precision=lax.Precision.HIGHEST)
    den = jnp.einsum('bok,bkt->bot', weights, bs,
                     precision=lax.Precision.HIGHEST)
    return num / den, pv, intvls


if __name__ == "__main__":
    key = jax.random.PRNGKey(0)
    kx, kc, kw, klw, klb = jax.random.split(key, 5)

    batch, in_features = 16, 64
    d_space, n_control_points, n_data_points = 2, 16, 64

    x = jax.random.normal(kx, (batch, in_features), dtype=jnp.float32)
    control_points = jax.random.normal(
        kc, (batch, d_space, n_control_points), dtype=jnp.float32)
    # Rational-Bezier weights are positive in the EGAN model (sigmoid output).
    weights = jax.random.uniform(kw, (batch, 1, n_control_points),
                                 minval=0.5, maxval=1.5, dtype=jnp.float32)
    bound = 1.0 / jnp.sqrt(jnp.float32(in_features))
    lin_weight = jax.random.uniform(klw, (n_data_points - 1, in_features),
                                    minval=-bound, maxval=bound, dtype=jnp.float32)
    lin_bias = jax.random.uniform(klb, (n_data_points - 1,),
                                  minval=-bound, maxval=bound, dtype=jnp.float32)

    dp, pv, intvls = bezier_layer_forward(
        x, control_points, weights, lin_weight, lin_bias, tile_b=8)
    jax.block_until_ready((dp, pv, intvls))

    dp_r, pv_r, intvls_r = _reference(x, control_points, weights, lin_weight, lin_bias)

    assert dp.shape == (batch, d_space, n_data_points)
    assert pv.shape == (batch, 1, n_data_points)
    assert intvls.shape == (batch, n_data_points)
    assert jnp.allclose(intvls, intvls_r, atol=1e-5, rtol=1e-5), "intvls mismatch"
    assert jnp.allclose(pv, pv_r, atol=1e-5, rtol=1e-5), "pv mismatch"
    assert jnp.allclose(dp, dp_r, atol=1e-3, rtol=1e-3), "dp mismatch"

    print("KERNEL_OK")
</pallas_src>

<mosaic_0001>
module attributes {stable_mosaic.version = 11 : i64} {
  func.func @_bezier_kernel(%arg0: i32, %arg1: memref<8x64xf32, #tpu.memory_space<vmem>>, %arg2: memref<64x64xf32, #tpu.memory_space<vmem>>, %arg3: memref<1x64xf32, #tpu.memory_space<vmem>>, %arg4: memref<16x1xf32, #tpu.memory_space<vmem>>, %arg5: memref<8x2x16xf32, #tpu.memory_space<vmem>>, %arg6: memref<8x1x16xf32, #tpu.memory_space<vmem>>, %arg7: memref<8x2x64xf32, #tpu.memory_space<vmem>>, %arg8: memref<8x1x64xf32, #tpu.memory_space<vmem>>, %arg9: memref<8x64xf32, #tpu.memory_space<vmem>>) attributes {dimension_semantics = [#tpu.dimension_semantics<parallel>], iteration_bounds = array<i64: 2>, scalar_prefetch = 0 : i64, scratch_operands = 0 : i64, tpu.core_type = #tpu.core_type<tc>, window_params = [{transform_indices = @transform_0, window_bounds = array<i64: 8, 64>}, {pipeline_mode = #tpu.pipeline_mode<synchronous>, transform_indices = @transform_1, window_bounds = array<i64: 64, 64>}, {pipeline_mode = #tpu.pipeline_mode<synchronous>, transform_indices = @transform_2, window_bounds = array<i64: 1, 64>}, {pipeline_mode = #tpu.pipeline_mode<synchronous>, transform_indices = @transform_3, window_bounds = array<i64: 16, 1>}, {transform_indices = @transform_4, window_bounds = array<i64: 8, 2, 16>}, {transform_indices = @transform_5, window_bounds = array<i64: 8, 1, 16>}, {transform_indices = @transform_6, window_bounds = array<i64: 8, 2, 64>}, {transform_indices = @transform_7, window_bounds = array<i64: 8, 1, 64>}, {transform_indices = @transform_8, window_bounds = array<i64: 8, 64>}]} {
    %c0 = arith.constant 0 : index
    %c0_0 = arith.constant 0 : index
    %0 = vector.load %arg1[%c0, %c0_0] : memref<8x64xf32, #tpu.memory_space<vmem>>, vector<8x64xf32>
    %c0_1 = arith.constant 0 : index
    %c0_2 = arith.constant 0 : index
    %1 = vector.load %arg2[%c0_1, %c0_2] : memref<64x64xf32, #tpu.memory_space<vmem>>, vector<64x64xf32>
    %cst = arith.constant dense<0.000000e+00> : vector<8x64xf32>
    %2 = tpu.matmul %0, %1, %cst {dimension_numbers = #tpu.dot_dimension_numbers<[1], [1], [0], [0], [0, 0, 1, 0], [], []>, precision = #tpu.contract_precision<fp32>} : vector<8x64xf32>, vector<64x64xf32>, vector<8x64xf32> -> vector<8x64xf32>
    %c0_3 = arith.constant 0 : index
    %c0_4 = arith.constant 0 : index
    %3 = vector.load %arg3[%c0_3, %c0_4] : memref<1x64xf32, #tpu.memory_space<vmem>>, vector<1x64xf32>
    %4 = vector.broadcast %3 : vector<1x64xf32> to vector<8x64xf32>
    %5 = arith.addf %2, %4 : vector<8x64xf32>
    %cst_5 = arith.constant dense<0xFF800000> : vector<8xf32>
    %6 = vector.multi_reduction <maximumf>, %5, %cst_5 [1] : vector<8x64xf32> to vector<8xf32>
    %7 = vector.shape_cast %6 : vector<8xf32> to vector<8x1xf32>
    %8 = vector.broadcast %7 : vector<8x1xf32> to vector<8x64xf32>
    %9 = arith.subf %5, %8 : vector<8x64xf32>
    %10 = math.exp %9 : vector<8x64xf32>
    %cst_6 = arith.constant dense<0.000000e+00> : vector<8xf32>
    %11 = vector.multi_reduction <add>, %10, %cst_6 [1] : vector<8x64xf32> to vector<8xf32>
    %12 = vector.shape_cast %11 : vector<8xf32> to vector<8x1xf32>
    %13 = vector.broadcast %12 : vector<8x1xf32> to vector<8x64xf32>
    %14 = arith.divf %10, %13 : vector<8x64xf32>
    %c0_7 = arith.constant 0 : index
    %c0_8 = arith.constant 0 : index
    %15 = vector.load %arg9[%c0_7, %c0_8] : memref<8x64xf32, #tpu.memory_space<vmem>>, vector<8x64xf32>
    tpu.vector_store %arg9[%c0_7, %c0_8], %14 {strides = array<i32>} : memref<8x64xf32, #tpu.memory_space<vmem>>, vector<8x64xf32>,
    %16 = tpu.iota {dimensions = array<i32: 1>} : vector<1x64x64xi32>
    %17 = tpu.iota {dimensions = array<i32: 2>} : vector<1x64x64xi32>
    %18 = arith.cmpi sle, %16, %17 : vector<1x64x64xi32>
    %19 = vector.shape_cast %14 : vector<8x64xf32> to vector<8x64x1xf32>
    %cst_9 = arith.constant 0.000000e+00 : f32
    %20 = vector.shape_cast %18 : vector<1x64x64xi1> to vector<1x64x64xi1>
    %21 = vector.broadcast %20 : vector<1x64x64xi1> to vector<8x64x64xi1>
    %22 = vector.shape_cast %19 : vector<8x64x1xf32> to vector<8x64x1xf32>
    %23 = vector.broadcast %22 : vector<8x64x1xf32> to vector<8x64x64xf32>
    %24 = vector.broadcast %cst_9 : f32 to vector<8x64x64xf32>
    %25 = arith.select %21, %23, %24 : vector<8x64x64xi1>, vector<8x64x64xf32>
    %cst_10 = arith.constant dense<0.000000e+00> : vector<8x64xf32>
    %26 = vector.multi_reduction <add>, %25, %cst_10 [1] : vector<8x64x64xf32> to vector<8x64xf32>
    %cst_11 = arith.constant 0.000000e+00 : f32
    %cst_12 = arith.constant 1.000000e+00 : f32
    %27 = vector.broadcast %cst_11 : f32 to vector<8x64xf32>
    %28 = arith.maximumf %27, %26 : vector<8x64xf32>
    %29 = vector.broadcast %cst_12 : f32 to vector<8x64xf32>
    %30 = arith.minimumf %29, %28 : vector<8x64xf32>
    %31 = vector.shape_cast %30 : vector<8x64xf32> to vector<8x1x64xf32>
    %c0_13 = arith.constant 0 : index
    %c0_14 = arith.constant 0 : index
    %c0_15 = arith.constant 0 : index
    %32 = vector.load %arg8[%c0_13, %c0_14, %c0_15] : memref<8x1x64xf32, #tpu.memory_space<vmem>>, vector<8x1x64xf32>
    tpu.vector_store %arg8[%c0_13, %c0_14, %c0_15], %31 {strides = array<i32>} : memref<8x1x64xf32, #tpu.memory_space<vmem>>, vector<8x1x64xf32>,
    %cst_16 = arith.constant 1.000000e-07 : f32
    %33 = vector.broadcast %cst_16 : f32 to vector<8x64xf32>
    %34 = arith.addf %30, %33 : vector<8x64xf32>
    %35 = math.log %34 : vector<8x64xf32>
    %36 = vector.shape_cast %35 : vector<8x64xf32> to vector<8x1x64xf32>
    %cst_17 = arith.constant 1.000000e+00 : f32
    %37 = vector.broadcast %cst_17 : f32 to vector<8x64xf32>
    %38 = arith.subf %37, %30 : vector<8x64xf32>
    %cst_18 = arith.constant 1.000000e-07 : f32
    %39 = vector.broadcast %cst_18 : f32 to vector<8x64xf32>
    %40 = arith.addf %38, %39 : vector<8x64xf32>
    %41 = math.log %40 : vector<8x64xf32>
    %42 = vector.shape_cast %41 : vector<8x64xf32> to vector<8x1x64xf32>
    %43 = tpu.iota {dimensions = array<i32: 1>} : vector<1x16x1xi32>
    %44 = arith.sitofp %43 : vector<1x16x1xi32> to vector<1x16x1xf32>
    %cst_19 = arith.constant 1.500000e+01 : f32
    %45 = vector.broadcast %cst_19 : f32 to vector<1x16x1xf32>
    %46 = arith.subf %45, %44 : vector<1x16x1xf32>
    %47 = vector.broadcast %44 : vector<1x16x1xf32> to vector<8x16x64xf32>
    %48 = vector.broadcast %36 : vector<8x1x64xf32> to vector<8x16x64xf32>
    %49 = arith.mulf %47, %48 : vector<8x16x64xf32>
    %50 = vector.broadcast %46 : vector<1x16x1xf32> to vector<8x16x64xf32>
    %51 = vector.broadcast %42 : vector<8x1x64xf32> to vector<8x16x64xf32>
    %52 = arith.mulf %50, %51 : vector<8x16x64xf32>
    %53 = arith.addf %49, %52 : vector<8x16x64xf32>
    %c0_20 = arith.constant 0 : index
    %c0_21 = arith.constant 0 : index
    %54 = vector.load %arg4[%c0_20, %c0_21] : memref<16x1xf32, #tpu.memory_space<vmem>>, vector<16x1xf32>
    %55 = vector.shape_cast %54 : vector<16x1xf32> to vector<1x16x1xf32>
    %56 = vector.broadcast %55 : vector<1x16x1xf32> to vector<8x16x64xf32>
    %57 = arith.addf %53, %56 : vector<8x16x64xf32>
    %58 = math.exp %57 : vector<8x16x64xf32>
    %c0_22 = arith.constant 0 : index
    %c0_23 = arith.constant 0 : index
    %c0_24 = arith.constant 0 : index
    %59 = vector.load %arg5[%c0_22, %c0_23, %c0_24] : memref<8x2x16xf32, #tpu.memory_space<vmem>>, vector<8x2x16xf32>
    %c0_25 = arith.constant 0 : index
    %c0_26 = arith.constant 0 : index
    %c0_27 = arith.constant 0 : index
    %60 = vector.load %arg6[%c0_25, %c0_26, %c0_27] : memref<8x1x16xf32, #tpu.memory_space<vmem>>, vector<8x1x16xf32>
    %61 = vector.broadcast %60 : vector<8x1x16xf32> to vector<8x2x16xf32>
    %62 = arith.mulf %59, %61 : vector<8x2x16xf32>
    "tpu.trace_start"() <{level = 10 : i32, message = "bdk,bkt->bdt"}> : () -> ()
    %cst_28 = arith.constant dense<0.000000e+00> : vector<8x2x64xf32>
    %63 = tpu.matmul %62, %58, %cst_28 {dimension_numbers = #tpu.dot_dimension_numbers<[2], [1], [1], [2], [0, 0, 0, 1, 1, 2], [0], [0]>, precision = #tpu.contract_precision<fp32>} : vector<8x2x16xf32>, vector<8x16x64xf32>, vector<8x2x64xf32> -> vector<8x2x64xf32>
    "tpu.trace_stop"() : () -> ()
    %c0_29 = arith.constant 0 : index
    %c0_30 = arith.constant 0 : index
    %c0_31 = arith.constant 0 : index
    %64 = vector.load %arg6[%c0_29, %c0_30, %c0_31] : memref<8x1x16xf32, #tpu.memory_space<vmem>>, vector<8x1x16xf32>
    "tpu.trace_start"() <{level = 10 : i32, message = "bok,bkt->bot"}> : () -> ()
    %cst_32 = arith.constant dense<0.000000e+00> : vector<8x1x64xf32>
    %65 = tpu.matmul %64, %58, %cst_32 {dimension_numbers = #tpu.dot_dimension_numbers<[2], [1], [1], [2], [0, 0, 0, 1, 1, 2], [0], [0]>, precision = #tpu.contract_precision<fp32>} : vector<8x1x16xf32>, vector<8x16x64xf32>, vector<8x1x64xf32> -> vector<8x1x64xf32>
    "tpu.trace_stop"() : () -> ()
    %66 = vector.broadcast %65 : vector<8x1x64xf32> to vector<8x2x64xf32>
    %67 = arith.divf %63, %66 : vector<8x2x64xf32>
    %c0_33 = arith.constant 0 : index
    %c0_34 = arith.constant 0 : index
    %c0_35 = arith.constant 0 : index
    %68 = vector.load %arg7[%c0_33, %c0_34, %c0_35] : memref<8x2x64xf32, #tpu.memory_space<vmem>>, vector<8x2x64xf32>
    tpu.vector_store %arg7[%c0_33, %c0_34, %c0_35], %67 {strides = array<i32>} : memref<8x2x64xf32, #tpu.memory_space<vmem>>, vector<8x2x64xf32>,
    return
  }
  func.func @transform_0(%arg0: i32) -> (i32, i32) {
    %c0_i32 = arith.constant 0 : i32
    %c0_i32_0 = arith.constant 0 : i32
    return %arg0, %c0_i32 : i32, i32
  }
  func.func @transform_1(%arg0: i32) -> (i32, i32) {
    %c0_i32 = arith.constant 0 : i32
    %c0_i32_0 = arith.constant 0 : i32
    %c0_i32_1 = arith.constant 0 : i32
    return %c0_i32, %c0_i32_0 : i32, i32
  }
  func.func @transform_2(%arg0: i32) -> (i32, i32) {
    %c0_i32 = arith.constant 0 : i32
    %c0_i32_0 = arith.constant 0 : i32
    %c0_i32_1 = arith.constant 0 : i32
    return %c0_i32, %c0_i32_0 : i32, i32
  }
  func.func @transform_3(%arg0: i32) -> (i32, i32) {
    %c0_i32 = arith.constant 0 : i32
    %c0_i32_0 = arith.constant 0 : i32
    %c0_i32_1 = arith.constant 0 : i32
    return %c0_i32, %c0_i32_0 : i32, i32
  }
  func.func @transform_4(%arg0: i32) -> (i32, i32, i32) {
    %c0_i32 = arith.constant 0 : i32
    %c0_i32_0 = arith.constant 0 : i32
    %c0_i32_1 = arith.constant 0 : i32
    return %arg0, %c0_i32, %c0_i32_0 : i32, i32, i32
  }
  func.func @transform_5(%arg0: i32) -> (i32, i32, i32) {
    %c0_i32 = arith.constant 0 : i32
    %c0_i32_0 = arith.constant 0 : i32
    %c0_i32_1 = arith.constant 0 : i32
    return %arg0, %c0_i32, %c0_i32_0 : i32, i32, i32
  }
  func.func @transform_6(%arg0: i32) -> (i32, i32, i32) {
    %c0_i32 = arith.constant 0 : i32
    %c0_i32_0 = arith.constant 0 : i32
    %c0_i32_1 = arith.constant 0 : i32
    return %arg0, %c0_i32, %c0_i32_0 : i32, i32, i32
  }
  func.func @transform_7(%arg0: i32) -> (i32, i32, i32) {
    %c0_i32 = arith.constant 0 : i32
    %c0_i32_0 = arith.constant 0 : i32
    %c0_i32_1 = arith.constant 0 : i32
    return %arg0, %c0_i32, %c0_i32_0 : i32, i32, i32
  }
  func.func @transform_8(%arg0: i32) -> (i32, i32) {
    %c0_i32 = arith.constant 0 : i32
    %c0_i32_0 = arith.constant 0 : i32
    return %arg0, %c0_i32 : i32, i32
  }
}

</mosaic_0001>

<bundles_post_ra>
// kernel: tpu_custom_call.1
= control target key start
LH: loop header
LB: loop body
LE: loop exit
PB: predicated region body
PF: predicated region fallthrough
CT: control target
= control target key end

     0   :  { %s6534_s0 = inlined_call_operand.vmem [shape: f32[16,64], index: 0, kind: input, shape index: {}]   ;;  %s6535_s1 = inlined_call_operand.hbm [shape: f32[64,64], index: 1, kind: input, shape index: {}]   ;;  %s6536_s2 = inlined_call_operand.vmem [shape: f32[1,64], index: 2, kind: input, shape index: {}]   ;;  %s6537_s3 = inlined_call_operand.vmem [shape: f32[16,1], index: 3, kind: input, shape index: {}]   ;;  %s6538_s4 = inlined_call_operand.hbm [shape: f32[16,2,16], index: 4, kind: input, shape index: {}]   ;;  %s6539_s5 = inlined_call_operand.hbm [shape: f32[16,1,16], index: 5, kind: input, shape index: {}]   ;;  %s6540_s6 = inlined_call_operand.hbm [shape: f32[16,2,64], index: 6, kind: output, shape index: {0}]   ;;  %s6541_s7 = inlined_call_operand.hbm [shape: f32[16,1,64], index: 7, kind: output, shape index: {1}]   ;;  %s6542_s8 = inlined_call_operand.hbm [shape: f32[16,64], index: 8, kind: output, shape index: {2}]  }
   0x1   :  { %6570 = sst [smem:[#allocation38_spill]] %s6535_s1 }
   0x2   :  { %6571 = sst [smem:[#allocation39_spill]] %s6538_s4 }
   0x3   :  { %14 = vsyncpa [#allocation3], 0 }
   0x4   :  { %15 = vsyncpa [#allocation6], 0 }
   0x5   :  { %17 = vsyncpa [#allocation6 + $0x1], 0 }
   0x6   :  { %18 = vsyncpa [#allocation4], 0 }
   0x7   :  { %20 = vsyncpa [#allocation4 + $0x1], 0 }
   0x8   :  { %21 = vsyncpa [#allocation10], 0 }
   0x9   :  { %23 = vsyncpa [#allocation10 + $0x1], 0  ;;  %s5142_s27 = smov 0   ;;  %s5144_s28 = smov 0  }
   0xa   :  { %s5146_s29 = smov 0   ;;  %s5148_s30 = smov 0  }
   0xb LB: > { %6572 = sst [smem:[#allocation16_spill]] %s5079_s29  ;;  %s5163_s9 = sadd.s32 1, %s5083_s30   ;;  %s5083_s30 = sphi %s5148_s30, %s6638_s30   ;;  %s5079_s29 = sphi %s5146_s29, %s6640_s29   ;;  %s5075_s28 = sphi %s5144_s28, %s6642_s28   ;;  %s5071_s27 = sphi %s5142_s27, %s6641_s27  }
   0xc   : > { %6573 = sst [smem:[#allocation17_spill]] %s5083_s30  ;;  %s125_s10 = sadd.s32 1, %s5079_s29 }
   0xd   : > { %6574 = sst [smem:[#allocation18_spill]] %s5163_s9  ;;  %s122_s11 = ssub.s32 %s5083_s30, %s5163_s9 }
   0xe   : > { %p132_p0 = scmp.ne.s32.totalorder %s5079_s29, %s5075_s28  ;;  %p123_p1 = scmp.eq.s32.totalorder %s122_s11, 0 }
   0xf   : > { %p133_p2 = scmp.eq.s32.totalorder %s5083_s30, 0  ;;  %p4661_p4 = scmp.lt.s32.totalorder %s5083_s30, 2 }
  0x10   : > { %s5174_s12 = scalar_select %p123_p1, %s5079_s29, %s125_s10  }
  0x11   : > { %p134_p5 = por %p133_p2, %p132_p0  ;;  %s293_s13 = sand.u32 1, %s5083_s30  }
  0x12   : > { %6575 = sst [smem:[#allocation19_spill]] %s5174_s12  ;;  %s295_s14 = sand.u32 1, %s5079_s29  }
  0x13   : > { %s4601_s15 = sshll.u32 %s295_s14, 4  ;;  %s4623_s16 = sshll.u32 %s5083_s30, 4 }
  0x14   : > { %s6576_s4 = sld [smem:[#allocation39_spill]]  ;;  %s297_s21 = scalar_lea.vmem [#allocation5], %s4601_s15 }
  0x15   : > { %s305_s22 = sshll.u32 %s297_s21, 4  ;;  %p5187_p6 = pnand %p4661_p4, %p134_p5  ;;  %s306_s22 = int_to_ptr.vmem [resolvable:$true] %s305_s22 }
  0x16   : > { %s4604_s24 = sshll.u32 %s295_s14, 3  ;;  %s5191_s25 = scalar_lea.sflag [#allocation6], %s293_s13 }
  0x17   : > { %p4867_p8 = pneg %p5187_p6 }
  0x1a   : > { %s302_s19 = scalar_lea.hbm %s6576_s4, %s4623_s16  ;;  %s4870_s16 = scalar_lea.hbm %s6576_s4, 32 }
  0x1b   : > { %s303_s20 = sshll.u32 %s302_s19, 4  ;;  %s304_s20 = int_to_ptr.hbm [resolvable:$true] %s303_s20 }
  0x1c   : > { %s4863_s26 = sshra.s32 %s304_s20, 4  ;;  %s4864_s26 = int_to_ptr.hbm [resolvable:$true] %s4863_s26 }
  0x1d   : > { %s4865_s10 = scalar_lea.hbm %s4864_s26, 16  ;;  %p4871_p11 = scmp.lt.s32.totalorder %s4864_s26, %s6576_s4 }
  0x1e   : > { %p4866_p7 = scmp.ne.s32.totalorder %s4864_s26, %s4865_s10  ;;  %p4872_p12 = scmp.lt.s32.totalorder %s4870_s16, %s4865_s10 }
  0x20   : > { %p4868_p9 = pnand %p4867_p8, %p4866_p7  ;;  %p4873_p13 = por %p4872_p12, %p4871_p11 }
  0x22   : > { %p4869_p10 = pneg %p4868_p9 }
  0x24   : > { %p4874_p1 = pnand %p4873_p13, %p4869_p10 }
  0x26   : > { %4877 = shalt.err (!%p4874_p1)
}
  0x27   : > { %s5085_s13 = smov 32   ;;  %s5086_s14 = smov 2  }
  0x28   : > { %4646 = dma.hbm_to_vmem [thread:$0]  (!%p5187_p6), %s304_s20, 256, %s306_s22, %s5191_s25, %s5085_s13, %s5085_s13, %s5086_s14  }
  0x29   : > { %s319_s19 = scalar_lea.vmem [#allocation7], %s4604_s24  ;;  %s5210_s26 = sadd.s32 4294967295, %s5083_s30  }
  0x2a   : > { %s5207_s21 = sshll.u32 %s319_s19, 4  ;;  %s6543_s10 = sadd.s32 4294967294, %s5083_s30   ;;  %s327_s21 = int_to_ptr.vmem [resolvable:$true] %s5207_s21 }
  0x2b   : > { %p138_p2 = scmp.ne.s32.totalorder %s5075_s28, %s5071_s27  ;;  %p139_p4 = scmp.eq.s32.totalorder %s5210_s26, 0 }
  0x2c   : > { %p188_p5 = scmp.eq.s32.totalorder %s5210_s26, 1  ;;  %p194_p7 = scmp.eq.s32.totalorder %s6543_s10, 1 }
  0x2d   : > { %p4598_p9 = scmp.ge.s32.totalorder %s5083_s30, 1  ;;  %p5222_p10 = por %p139_p4, %p138_p2 }
  0x2e   : > { %p5229_p11 = por %p188_p5, %p132_p0  ;;  %p5233_p12 = por %p194_p7, %p138_p2 }
  0x2f   : > { %p253_p13 = scmp.lt.s32.totalorder %s5083_s30, 3  ;;  %s6581_s1 = sld [smem:[#allocation38_spill]] }
  0x30   : > { %s5087_s18 = smov [#allocation2]   ;;  %s4605_s14 = sshll.u32 %s5083_s30, 3 }
  0x31   : > { %p5241_p1 = pnand %p4598_p9, %p253_p13  ;;  %s266_s13 = sshll.u32 %s5087_s18, 4  ;;  %s267_s13 = int_to_ptr.vmem [resolvable:$true] %s266_s13 }
  0x32   : > { %s323_s11 = scalar_lea.hbm %s6539_s5, %s4605_s14  ;;  %s5089_s4 = smov 8  }
  0x33   : > { %p4639_p0 = pneg %p5241_p1  ;;  %s324_s15 = sshll.u32 %s323_s11, 4  ;;  %s325_s15 = int_to_ptr.hbm [resolvable:$true] %s324_s15 }
  0x34   : > { %s4923_s12 = sshra.s32 %s325_s15, 4  ;;  %s4930_s30 = scalar_lea.hbm %s6539_s5, 16  ;;  %s4924_s12 = int_to_ptr.hbm [resolvable:$true] %s4923_s12 }
  0x35   : > { %s264_s16 = sshll.u32 %s6581_s1, 4  ;;  %p4640_p2 = pnand %p4639_p0, %p139_p4  ;;  %s265_s16 = int_to_ptr.hbm [resolvable:$true] %s264_s16 }
  0x36   : > { %s5088_s1 = smov 128   ;;  %s4925_s29 = scalar_lea.hbm %s4924_s12, 8 }
  0x37   : > { %4642 = dma.hbm_to_vmem [thread:$0]  (!%p4640_p2), %s265_s16, 1024, %s267_s13, [#allocation3], %s5088_s1, %s5088_s1, %s5089_s4  }
  0x38   : > { %p4926_p5 = scmp.ne.s32.totalorder %s4924_s12, %s4925_s29  ;;  %p4931_p13 = scmp.lt.s32.totalorder %s4924_s12, %s6539_s5 }
  0x39   : > { %p4932_p0 = scmp.lt.s32.totalorder %s4930_s30, %s4925_s29 }
  0x3a   : > { %p4928_p7 = pnand %p4926_p5, %p4867_p8 }
  0x3b   : > { %p4933_p3 = por %p4932_p0, %p4931_p13 }
  0x3c   : > { %p4929_p9 = pneg %p4928_p7 }
  0x3e   : > { %p4934_p2 = pnand %p4933_p3, %p4929_p9 }
  0x40   : > { %4937 = shalt.err (!%p4934_p2)
}
  0x41   : > { %s5090_s1 = smov 16   ;;  %s5091_s4 = smov 1  }
  0x42   : > { %4649 = dma.hbm_to_vmem [thread:$0]  (!%p5187_p6), %s325_s15, 128, %s327_s21, %s5191_s25, %s5090_s1, %s5090_s1, %s5091_s4  }
  0x43   : > { %338 = sbr.rel (%p5241_p1) target bundleno = 1382 (0x566), region = 44 }
  0x48   : > { %5054 = dma.done.wait (%p139_p4), [#allocation3], 1024  }
  0x49   : > { %5056 = vsyncadd (%p139_p4), [#allocation3], 4294966272  ;;  %s345_s29 = sand.u32 1, %s5210_s26   ;;  %s5274_s30 = sand.u32 1, %s5075_s28  }
  0x4a   : > { %s4608_s9 = sshll.u32 %s5274_s30, 4  ;;  %s346_s12 = scalar_lea.sflag [#allocation6], %s345_s29 }
  0x4b   : > { %s5281_s23 = scalar_lea.vmem [#allocation5], %s4608_s9 }
  0x4c   : > { %5058 = dma.done.wait (%p5222_p10), %s346_s12, 384  }
  0x4d   : > { %5060 = vsyncadd (%p5222_p10), %s346_s12, 4294966912  ;;  %vm433_vm0 = vcmask 523264   ;;  %v428_v0 = vld [vmem:[#allocation2 + $0x38] sm:$0xff]  ;;  %v427_v1 = vld [vmem:[#allocation2 + $0x30] sm:$0xff]  ;;  %p412_p3 = scmp.lt.s32.totalorder %s5210_s26, 1  ;;  %s5409_s14 = sshll.u32 %s5274_s30, 3 }
  0x4e   : > { %v426_v2 = vld [vmem:[#allocation2 + $0x28] sm:$0xff]  ;;  %v459_v3 = vsel %vm433_vm0, %v428_v0, 0  ;;  %v456_v4 = vsel %vm433_vm0, %v427_v1, 0  ;;  %v425_v6 = vld [vmem:[#allocation2 + $0x20] sm:$0xff]  ;;  %v424_v7 = vld [vmem:[#allocation2 + $0x18] sm:$0xff]  ;;  %s411_s1 = scalar_lea.vmem [#allocation11], %s5409_s14 }
  0x4f   : > { %v453_v5 = vsel %vm433_vm0, %v426_v2, 0  ;;  %v5290_v8 = vand.u32 4294901760, %v459_v3  ;;  %v5292_v9 = vand.u32 4294901760, %v456_v4  ;;  %v450_v11 = vsel %vm433_vm0, %v425_v6, 0  ;;  %v423_v17 = vld [vmem:[#allocation2 + $0x10] sm:$0xff]  ;;  %v422_v26 = vld [vmem:[#allocation2 + $0x8] sm:$0xff] }
  0x50   : > { %v5294_v10 = vand.u32 4294901760, %v453_v5  ;;  %v5297_v12 = vand.u32 4294901760, %v450_v11  ;;  %v447_v16 = vsel %vm433_vm0, %v424_v7, 0  ;;  %v444_v21 = vsel %vm433_vm0, %v423_v17, 0  ;;  %s413_s25 = scalar_select %p412_p3, %s5210_s26, 1  ;;  %v421_v34 = vld [vmem:[#allocation2] sm:$0xff] }
  0x51   : > { %470 = vmatpush.xpose.msra.mxu0 %v5290_v8  ;;  %v5301_v13 = vsub.f32 %v459_v3, %v5290_v8  ;;  %v5304_v14 = vsub.f32 %v456_v4, %v5292_v9  ;;  %602 = vmatpush.xpose.msra.mxu3 %v5290_v8  ;;  %v5315_v20 = vand.u32 4294901760, %v447_v16  ;;  %v5332_v28 = vand.u32 4294901760, %v444_v21  ;;  %v4770_v63 = vld [vmem:[%s6536_s2] ss:$0 sm:$0xff]  ;;  %s5446_s4 = scalar_lea.vmem [#allocation7], %s5409_s14  ;;  %s5578_s12 = scalar_lea.vmem [#allocation9], %s5409_s14 }
  0x52   : > { %v5307_v15 = vsub.f32 %v453_v5, %v5294_v10  ;;  %v5327_v25 = vsub.f32 %v450_v11, %v5297_v12  ;;  %v441_v29 = vsel %vm433_vm0, %v422_v26, 0  ;;  %s4613_s21 = sshll.u32 %s413_s25, 3  ;;  %v438_v36 = vsel %vm433_vm0, %v421_v34, 0  ;;  %s4400_s16 = sshll.u32 %s5578_s12, 4  ;;  %s4401_s16 = int_to_ptr.vmem [resolvable:$true] %s4400_s16 }
  0x53   : > { %v504_v18 = vand.u32 4294901760, %v5301_v13  ;;  %v510_v19 = vand.u32 4294901760, %v5304_v14  ;;  %565 = vmatpush.xpose.msra.mxu2 %v5301_v13  ;;  %v5341_v33 = vsub.f32 %v447_v16, %v5315_v20  ;;  %v5345_v35 = vand.u32 4294901760, %v441_v29  ;;  %s415_s17 = scalar_lea.vmem %s6534_s0, %s4613_s21  ;;  %s6437_s13 = scalar_lea.sflag [#allocation10], %s345_s29 }
  0x54   : > { %v516_v24 = vand.u32 4294901760, %v5307_v15  ;;  %v522_v32 = vand.u32 4294901760, %v5327_v25  ;;  %v533_v40 = vsub.f32 %v444_v21, %v5332_v28  ;;  %v420_v41 = vld [vmem:[%s415_s17] sm:$0xff]  ;;  %v483_v43 = vand.u32 4294901760, %v438_v36  ;;  %s4973_s10 = scalar_lea.hbm %s6541_s7, 16 }
  0x55   : > { %v505_v22 = vsub.f32 %v5301_v13, %v504_v18  ;;  %472 = vmatpush.xpose.msra.mxu0 %v5292_v9  ;;  %v511_v23 = vsub.f32 %v5304_v14, %v510_v19  ;;  %604 = vmatpush.xpose.msra.mxu3 %v5292_v9  ;;  %v528_v39 = vand.u32 4294901760, %v5341_v33  ;;  %v539_v42 = vsub.f32 %v441_v29, %v5345_v35  ;;  %v1516_v13 = vld [vmem:[%s6537_s3 + $0x8] sm:$0xff] }
  0x56   : > { %v517_v31 = vsub.f32 %v5307_v15, %v516_v24  ;;  %v523_v38 = vsub.f32 %v5327_v25, %v522_v32  ;;  %v435_v44 = vsel %vm433_vm0, %v420_v41, 0  ;;  %v534_v47 = vand.u32 4294901760, %v533_v40 }
  0x57   : > { %v506_v27 = vand.u32 4294901760, %v505_v22  ;;  %568 = vmatpush.xpose.msra.mxu2 %v5304_v14  ;;  %v512_v30 = vand.u32 4294901760, %v511_v23  ;;  %v529_v46 = vsub.f32 %v5341_v33, %v528_v39  ;;  %v485_v48 = vand.u32 4294901760, %v435_v44 }
  0x58   : > { %v518_v37 = vand.u32 4294901760, %v517_v31  ;;  %v524_v45 = vand.u32 4294901760, %v523_v38  ;;  %v540_v50 = vand.u32 4294901760, %v539_v42  ;;  %v535_v52 = vsub.f32 %v533_v40, %v534_v47 }
  0x59   : > { %507 = vmatpush.xpose.msra.mxu1 %v506_v27  ;;  %474 = vmatpush.xpose.msra.mxu0 %v5294_v10  ;;  %v486_v49 = vsub.f32 %v435_v44, %v485_v48  ;;  %v530_v51 = vand.u32 4294901760, %v529_v46  ;;  %v545_v53 = vsub.f32 %v438_v36, %v483_v43  ;;  %v5092_v14 = vmov 0  }
  0x5a   : > { %606 = vmatpush.xpose.msra.mxu3 %v5294_v10  ;;  %v536_v56 = vand.u32 4294901760, %v535_v52  ;;  %v541_v57 = vsub.f32 %v539_v42, %v540_v50  ;;  %4708 = vset.pattern.permute.xlu1 %v5092_v14  ;;  %v723_v21 = vlaneseq  ;;  %vm1398_vm13 = vcmask 516096  }
  0x5b   : > { %571 = vmatpush.xpose.msra.mxu2 %v5307_v15  ;;  %v487_v54 = vand.u32 4294901760, %v486_v49  ;;  %v546_v58 = vand.u32 4294901760, %v545_v53  ;;  %1524 = vperm.xlu1 %4708, %v1516_v13   ;;  %v1515_v15 = vld [vmem:[%s6537_s3] sm:$0xff]  ;;  %vm1623_vm14 = vcmask 130048  }
  0x5c   : > { %v542_v60 = vand.u32 4294901760, %v541_v57  ;;  %v5397_v22 = vshrl.u32 %v723_v21, 7 }
  0x5d   : > { %513 = vmatpush.xpose.msra.mxu1 %v512_v30  ;;  %476 = vmatpush.xpose.msra.mxu0 %v5297_v12  ;;  %v488_v55 = vsub.f32 %v486_v49, %v487_v54  ;;  %v547_v61 = vsub.f32 %v545_v53, %v546_v58 }
  0x5e   : > { %608 = vmatpush.xpose.msra.mxu3 %v5297_v12  ;;  %v5400_v23 = vadd.s32 32, %v5397_v22  ;;  %v5420_v38 = vadd.s32 56, %v5397_v22 }
  0x5f   : > { %574 = vmatpush.xpose.msra.mxu2 %v5327_v25  ;;  %v489_v59 = vand.u32 4294901760, %v488_v55  ;;  %v548_v62 = vand.u32 4294901760, %v547_v61 }
  0x60   : > { %4713 = vset.pattern.permute.xlu0 %v5400_v23 }
  0x61   : > { %519 = vmatpush.xpose.msra.mxu1 %v518_v37  ;;  %478 = vmatpush.xpose.msra.mxu0 %v5315_v20 }
  0x62   : > { %610 = vmatpush.xpose.msra.mxu3 %v5315_v20 }
  0x63   : > { %577 = vmatpush.xpose.msra.mxu2 %v5341_v33  ;;  %1519 = vperm.xlu1 %4708, %v1515_v15  }
  0x65   : > { %525 = vmatpush.xpose.msra.mxu1 %v524_v45  ;;  %480 = vmatpush.xpose.msra.mxu0 %v5332_v28 }
  0x66   : > { %612 = vmatpush.xpose.msra.mxu3 %v5332_v28 }
  0x67   : > { %580 = vmatpush.xpose.msra.mxu2 %v533_v40  ;;  %v5426_v40 = vadd.s32 8, %v5397_v22 }
  0x69   : > { %531 = vmatpush.xpose.msra.mxu1 %v530_v51  ;;  %482 = vmatpush.xpose.msra.mxu0 %v5345_v35 }
  0x6a   : > { %614 = vmatpush.xpose.msra.mxu3 %v5345_v35 }
  0x6b   : > { %583 = vmatpush.xpose.msra.mxu2 %v539_v42  ;;  %4709 = vset.pattern.permute.xlu1 %v5397_v22  ;;  %v5433_v42 = vadd.s32 48, %v5397_v22 }
  0x6d   : > { %537 = vmatpush.xpose.msra.mxu1 %v536_v56  ;;  %484 = vmatpush.xpose.msra.mxu0 %v483_v43 }
  0x6e   : > { %616 = vmatpush.xpose.msra.mxu3 %v483_v43 }
  0x6f   : > { %586 = vmatpush.xpose.msra.mxu2 %v545_v53  ;;  %v733_v53 = vand.u32 127, %v723_v21 }
  0x70   : > { %490 = vmatmul.f32.vlgmr.msra.gmra.mxu0 %v489_v59 }
  0x71   : > { %635 = vmatpush.xpose.msrb.mxu0 %v504_v18  ;;  %543 = vmatpush.xpose.msra.mxu1 %v542_v60  ;;  %vm5499_vm5 = vcmp.le.s32.totalorder %v5426_v40, %v733_v53  ;;  %vm5505_vm6 = vcmp.le.s32.totalorder %v5397_v22, %v733_v53  ;;  %vm5534_vm9 = vcmp.le.s32.totalorder %v5400_v23, %v733_v53 }
  0x72   : > { %620 = vmatmul.f32.vlgmr.msra.gmra.mxu3 %v487_v54  ;;  %589 = vmatmul.f32.vlgmr.msra.gmra.mxu2 %v486_v49  ;;  %vm5553_vm11 = vcmp.le.s32.totalorder %v5433_v42, %v733_v53  ;;  %vm5565_vm12 = vcmp.le.s32.totalorder %v5420_v38, %v733_v53 }
  0x75   : > { %639 = vmatpush.xpose.msrb.mxu0 %v510_v19  ;;  %549 = vmatpush.xpose.msra.mxu1 %v548_v62 }
  0x78   : > { %551 = vmatmul.f32.vlgmr.msra.gmra.mxu1 %v485_v48 }
  0x79   : > { %678 = vmatpush.xpose.msrb.mxu1 %v5290_v8  ;;  %643 = vmatpush.xpose.msrb.mxu0 %v516_v24  ;;  %v5403_v24 = vadd.s32 16, %v5397_v22 }
  0x7b   : > { %4711 = vset.pattern.permute.xlu2 %v5403_v24  ;;  %vm5514_vm7 = vcmp.le.s32.totalorder %v5403_v24, %v733_v53 }
  0x7d   : > { %680 = vmatpush.xpose.msrb.mxu1 %v5292_v9  ;;  %647 = vmatpush.xpose.msrb.mxu0 %v522_v32 }
  0x81   : > { %682 = vmatpush.xpose.msrb.mxu1 %v5294_v10  ;;  %651 = vmatpush.xpose.msrb.mxu0 %v528_v39  ;;  %v5423_v39 = vadd.s32 24, %v5397_v22 }
  0x83   : > { %vm5526_vm8 = vcmp.le.s32.totalorder %v5423_v39, %v733_v53 }
  0x85   : > { %684 = vmatpush.xpose.msrb.mxu1 %v5297_v12  ;;  %655 = vmatpush.xpose.msrb.mxu0 %v534_v47 }
  0x89   : > { %686 = vmatpush.xpose.msrb.mxu1 %v5315_v20  ;;  %659 = vmatpush.xpose.msrb.mxu0 %v540_v50 }
  0x8d   : > { %688 = vmatpush.xpose.msrb.mxu1 %v5332_v28  ;;  %663 = vmatpush.xpose.msrb.mxu0 %v546_v58 }
  0x90   : > { %665 = vmatmul.f32.vlgmr.msrb.gmra.mxu0 %v485_v48 }
  0x91   : > { %690 = vmatpush.xpose.msrb.mxu1 %v5345_v35 }
  0x95   : > { %692 = vmatpush.xpose.msrb.mxu1 %v483_v43  ;;  %v5436_v43 = vadd.s32 40, %v5397_v22 }
  0x97   : > { %vm5539_vm10 = vcmp.le.s32.totalorder %v5436_v43, %v733_v53 }
  0x98   : > { %694 = vmatmul.f32.vlgmr.msrb.gmra.mxu1 %v485_v48 }
  0xcd   : > { %v5476_v48 = vpop.permute.xlu1 %1524 }
  0xd5   : > { %v5483_v49 = vpop.permute.xlu1 %1519 }
  0xed   : > { %v491_v0 = vpop.f32.mrf.mxu0 }
  0xee   : > { %v492_v1 = vadd.f32 %v4770_v63, %v491_v0 }
  0xf5   : > { %v552_v2 = vpop.f32.mrf.mxu1  ;;  %v590_v4 = vpop.f32.mrf.mxu2 }
  0xf6   : > { %v553_v3 = vadd.f32 %v552_v2, %v492_v1  ;;  %v621_v6 = vpop.f32.mrf.mxu3 }
  0xf8   : > { %v591_v5 = vadd.f32 %v590_v4, %v553_v3 }
  0xfa   : > { %v622_v7 = vadd.f32 %v621_v6, %v591_v5 }
 0x10d   : > { %v666_v8 = vpop.f32.mrf.mxu0 }
 0x10e   : > { %v667_v9 = vadd.f32 %v666_v8, %v622_v7 }
 0x115   : > { %v695_v10 = vpop.f32.mrf.mxu1 }
 0x116   : > { %v696_v11 = vadd.f32 %v695_v10, %v667_v9 }
 0x118   : > { %v698_v12 = vsel %vm433_vm0, %v696_v11, -inf }
 0x119   : > { %699 = vmax.xlane.f32.xlu0 %v698_v12 }
 0x18c   : > { %v700_v16 = vpop.xlane.xlu0 %699 }
 0x18d   : > { %v701_v17 = vsub.f32 %v696_v11, %v700_v16 }
 0x18f   : > { %v702_v18 = vmul.f32 1.442695, %v701_v17 }
 0x191   : > { %4779 = vpow2.f32 %v702_v18 }
 0x197   : > { %v4780_v19 = vpop.eup %4779 }
 0x198   : > { %v704_v20 = vsel %vm433_vm0, %v4780_v19, 0.0 }
 0x199   : > { %705 = vadd.xlane.f32.xlu0 %v704_v20 }
 0x20c   : > { %v706_v25 = vpop.xlane.xlu0 %705 }
 0x20d   : > { %4781 = vrcp.f32 %v706_v25  ;;  %v718_v29 = vand.u32 2147483648, %v706_v25  ;;  %v716_v31 = vand.u32 2147483647, %v706_v25  ;;  %vm712_vm2 = vweird.f32 %v706_v25 }
 0x20f   : > { %v719_v33 = vor.u32 1.1754944e-38, %v718_v29  ;;  %vm717_vm4 = vcmp.eq.f32.partialorder %v716_v31, 8.507059e+37 }
 0x213   : > { %v4782_v26 = vpop.eup %4781 }
 0x214   : > { %v708_v27 = vmul.f32 %v4782_v26, %v706_v25  ;;  %vm713_vm1 = vweird.f32 %v4782_v26 }
 0x215   : > { %vm714_vm3 = vmor %vm712_vm2, %vm713_vm1 }
 0x216   : > { %v709_v28 = vsub.f32 1.0, %v708_v27 }
 0x218   : > { %v710_v30 = vmul.f32 %v4782_v26, %v709_v28 }
 0x21a   : > { %v711_v32 = vadd.f32 %v4782_v26, %v710_v30 }
 0x21c   : > { %v715_v34 = vsel %vm714_vm3, %v4782_v26, %v711_v32 }
 0x21d   : > { %v720_v35 = vsel %vm717_vm4, %v719_v33, %v715_v34 }
 0x21e   : > { %v5411_v36 = vmul.f32 %v4780_v19, %v720_v35 }
 0x220   : > { %v742_v37 = vperm.slane %v5411_v36, 0  ;;  %722 = vst.msk [vmem:[%s411_s1] sm:$0xff] %vm433_vm0, %v5411_v36  ;;  %v791_v41 = vperm.slane %v5411_v36, 1  ;;  %v5442_v44 = vperm.slane %v5411_v36, 2  ;;  %v5452_v45 = vperm.slane %v5411_v36, 3 }
 0x221   : > { %v5463_v46 = vperm.slane %v5411_v36, 4  ;;  %v5467_v47 = vperm.slane %v5411_v36, 5  ;;  %v5487_v50 = vperm.slane %v5411_v36, 6  ;;  %v5493_v52 = vperm.slane %v5411_v36, 7 }
 0x222   : > { %771 = vperm.xlu0 %4713, %v742_v37   ;;  %759 = vperm.xlu2 %4711, %v742_v37  }
 0x223   : > { %747 = vperm.xlu1 %4709, %v742_v37  }
 0x22a   : > { %4724 = vset.pattern.permute.xlu0 %v5420_v38  ;;  %4712 = vset.pattern.permute.xlu2 %v5423_v39 }
 0x22b   : > { %4710 = vset.pattern.permute.xlu1 %v5426_v40 }
 0x232   : > { %838 = vperm.xlu0 %4724, %v791_v41   ;;  %765 = vperm.xlu2 %4712, %v742_v37  }
 0x233   : > { %753 = vperm.xlu1 %4710, %v742_v37  }
 0x23a   : > { %4729 = vset.pattern.permute.xlu0 %v5400_v23  ;;  %4715 = vset.pattern.permute.xlu2 %v5433_v42 }
 0x23b   : > { %4714 = vset.pattern.permute.xlu1 %v5436_v43 }
 0x242   : > { %869 = vperm.xlu0 %4729, %v5442_v44   ;;  %783 = vperm.xlu2 %4715, %v742_v37  }
 0x243   : > { %777 = vperm.xlu1 %4714, %v742_v37  }
 0x24a   : > { %4733 = vset.pattern.permute.xlu0 %v5403_v24  ;;  %4717 = vset.pattern.permute.xlu2 %v5397_v22 }
 0x24b   : > { %4716 = vset.pattern.permute.xlu1 %v5420_v38 }
 0x252   : > { %906 = vperm.xlu0 %4733, %v5452_v45   ;;  %796 = vperm.xlu2 %4717, %v791_v41  }
 0x253   : > { %789 = vperm.xlu1 %4716, %v742_v37  }
 0x25a   : > { %4737 = vset.pattern.permute.xlu0 %v5400_v23  ;;  %4719 = vset.pattern.permute.xlu2 %v5403_v24 }
 0x25b   : > { %4718 = vset.pattern.permute.xlu1 %v5426_v40 }
 0x262   : > { %918 = vperm.xlu0 %4737, %v5452_v45   ;;  %808 = vperm.xlu2 %4719, %v791_v41  }
 0x263   : > { %802 = vperm.xlu1 %4718, %v791_v41  }
 0x26a   : > { %4742 = vset.pattern.permute.xlu0 %v5426_v40  ;;  %4721 = vset.pattern.permute.xlu2 %v5400_v23 }
 0x26b   : > { %4720 = vset.pattern.permute.xlu1 %v5423_v39 }
 0x272   : > { %949 = vperm.xlu0 %4742, %v5463_v46   ;;  %820 = vperm.xlu2 %4721, %v791_v41  }
 0x273   : > { %814 = vperm.xlu1 %4720, %v791_v41  }
 0x27a   : > { %998 = vperm.xlu0 %4742, %v5467_v47   ;;  %4723 = vset.pattern.permute.xlu2 %v5433_v42 }
 0x27b   : > { %4722 = vset.pattern.permute.xlu1 %v5436_v43 }
 0x27c   : > { %v760_v56 = vpop.permute.xlu2 %759 }
 0x27d   : > { %v1152_v63 = vsel %vm5514_vm7, %v760_v56, 0.0 }
 0x27e   : > { %v1217_v3 = vsel %vm433_vm0, %v1152_v63, 0.0 }
 0x282   : > { %4749 = vset.pattern.permute.xlu0 %v5433_v42  ;;  %832 = vperm.xlu2 %4723, %v791_v41  }
 0x283   : > { %826 = vperm.xlu1 %4722, %v791_v41  }
 0x28a   : > { %979 = vperm.xlu0 %4749, %v5463_v46   ;;  %4726 = vset.pattern.permute.xlu2 %v5426_v40 }
 0x28b   : > { %4725 = vset.pattern.permute.xlu1 %v5397_v22 }
 0x28c   : > { %v766_v2 = vpop.permute.xlu2 %765 }
 0x28d   : > { %v1153_v4 = vsel %vm5526_vm8, %v766_v2, 0.0 }
 0x28e   : > { %v1219_v10 = vsel %vm433_vm0, %v1153_v4, 0.0 }
 0x292   : > { %1028 = vperm.xlu0 %4749, %v5467_v47   ;;  %851 = vperm.xlu2 %4726, %v5442_v44  }
 0x293   : > { %845 = vperm.xlu1 %4725, %v5442_v44  }
 0x294   : > { %v772_v7 = vpop.permute.xlu0 %771 }
 0x295   : > { %v748_v51 = vpop.permute.xlu1 %747  ;;  %v1154_v11 = vsel %vm5534_vm9, %v772_v7, 0.0 }
 0x296   : > { %v1150_v59 = vsel %vm5505_vm6, %v748_v51, 0.0  ;;  %v1221_v15 = vsel %vm433_vm0, %v1154_v11, 0.0 }
 0x297   : > { %v1214_v62 = vsel %vm433_vm0, %v1150_v59, 0.0  ;;  %v5586_v59 = vcvt.s32.f32 %v5397_v22 }
 0x299   : > { %v5594_v4 = vsub.f32 15.0, %v5586_v59 }
 0x29a   : > { %4756 = vset.pattern.permute.xlu0 %v5426_v40  ;;  %4728 = vset.pattern.permute.xlu2 %v5423_v39 }
 0x29b   : > { %4727 = vset.pattern.permute.xlu1 %v5403_v24 }
 0x29c   : > { %v784_v17 = vpop.permute.xlu2 %783 }
 0x29d   : > { %v1156_v20 = vsel %vm5553_vm11, %v784_v17, 0.0 }
 0x29e   : > { %v1225_v25 = vsel %vm433_vm0, %v1156_v20, 0.0 }
 0x2a2   : > { %1047 = vperm.xlu0 %4756, %v5487_v50   ;;  %863 = vperm.xlu2 %4728, %v5442_v44  }
 0x2a3   : > { %857 = vperm.xlu1 %4727, %v5442_v44  }
 0x2a5   : > { %v754_v55 = vpop.permute.xlu1 %753 }
 0x2a6   : > { %v1151_v58 = vsel %vm5499_vm5, %v754_v55, 0.0 }
 0x2a7   : > { %v1215_v61 = vsel %vm433_vm0, %v1151_v58, 0.0  ;;  %v4771_v58 = vld [vmem:[%s5446_s4] ss:$0 sm:$0xff] }
 0x2a8   : > { %v1216_v0 = vadd.f32 %v1215_v61, %v1214_v62  ;;  %v5589_v61 = vcvt.s32.f32 %v5426_v40  ;;  %v1575_v62 = vld [vmem:[%s5281_s23] sm:$0x3] }
 0x2a9   : > { %v1615_v2 = vmul.f32 %v4771_v58, %v1575_v62  ;;  %v839_v58 = vpop.permute.xlu0 %838 }
 0x2aa   : > { %1096 = vperm.xlu0 %4756, %v5493_v52   ;;  %4731 = vset.pattern.permute.xlu2 %v5426_v40  ;;  %v1218_v5 = vadd.f32 %v1217_v3, %v1216_v0 }
 0x2ab   : > { %4730 = vset.pattern.permute.xlu1 %v5397_v22  ;;  %v1625_v11 = vsel %vm1623_vm14, %v1615_v2, 0 }
 0x2ac   : > { %v1220_v12 = vadd.f32 %v1219_v10, %v1218_v5  ;;  %v797_v55 = vpop.permute.xlu2 %796  ;;  %v5597_v5 = vsub.f32 15.0, %v5589_v61 }
 0x2ad   : > { %v1158_v17 = vsel %vm5505_vm6, %v797_v55, 0.0 }
 0x2ae   : > { %v1222_v19 = vadd.f32 %v1221_v15, %v1220_v12 }
 0x2b2   : > { %4763 = vset.pattern.permute.xlu0 %v5433_v42  ;;  %900 = vperm.xlu2 %4731, %v5452_v45  }
 0x2b3   : > { %894 = vperm.xlu1 %4730, %v5452_v45  }
 0x2b5   : > { %v778_v9 = vpop.permute.xlu1 %777 }
 0x2b6   : > { %v1155_v13 = vsel %vm5539_vm10, %v778_v9, 0.0 }
 0x2b7   : > { %v1223_v18 = vsel %vm433_vm0, %v1155_v13, 0.0 }
 0x2b8   : > { %v1224_v21 = vadd.f32 %v1223_v18, %v1222_v19 }
 0x2ba   : > { %1077 = vperm.xlu0 %4763, %v5487_v50   ;;  %4732 = vset.pattern.permute.xlu2 %v5436_v43  ;;  %v1226_v28 = vadd.f32 %v1225_v25, %v1224_v21  ;;  %v5610_v25 = vand.u32 4294901760, %v1625_v11 }
 0x2bb   : > { %4735 = vset.pattern.permute.xlu1 %v5423_v39 }
 0x2bc   : > { %v809_v3 = vpop.permute.xlu2 %808 }
 0x2c2   : > { %1126 = vperm.xlu0 %4763, %v5493_v52   ;;  %875 = vperm.xlu2 %4732, %v5442_v44  }
 0x2c3   : > { %912 = vperm.xlu1 %4735, %v5452_v45  }
 0x2c5   : > { %v790_v27 = vpop.permute.xlu1 %789 }
 0x2c6   : > { %v1157_v29 = vsel %vm5565_vm12, %v790_v27, 0.0  ;;  %v1235_v27 = vsel %vm433_vm0, %v1158_v17, 0.0 }
 0x2c7   : > { %v1227_v30 = vsel %vm433_vm0, %v1157_v29, 0.0 }
 0x2c8   : > { %v1228_v31 = vadd.f32 %v1227_v30, %v1226_v28 }
 0x2ca   : > { %v1229_v32 = vrot.slane %v1228_v31, 4  ;;  %4734 = vset.pattern.permute.xlu2 %v5433_v42  ;;  %4769 = vset.pattern.permute.xlu0 %v5092_v14 }
 0x2cb   : > { %4738 = vset.pattern.permute.xlu1 %v5436_v43 }
 0x2cc   : > { %v1230_v33 = vadd.f32 %v1229_v32, %v1228_v31  ;;  %v821_v30 = vpop.permute.xlu2 %820  ;;  %v1160_v31 = vsel %vm5514_vm7, %v809_v3, 0.0 }
 0x2ce   : > { %v1231_v34 = vrot.slane %v1230_v33, 2 }
 0x2d0   : > { %v1232_v35 = vadd.f32 %v1231_v34, %v1230_v33 }
 0x2d2   : > { %v1233_v36 = vrot.slane %v1232_v35, 1  ;;  %881 = vperm.xlu2 %4734, %v5442_v44  }
 0x2d3   : > { %924 = vperm.xlu1 %4738, %v5452_v45  }
 0x2d4   : > { %v1234_v37 = vadd.f32 %v1233_v36, %v1232_v35  ;;  %v1238_v36 = vsel %vm433_vm0, %v1160_v31, 0.0 }
 0x2d5   : > { %v803_v63 = vpop.permute.xlu1 %802 }
 0x2d6   : > { %v1382_v41 = vmax.f32 %v1234_v37, 0.0  ;;  %v1159_v10 = vsel %vm5499_vm5, %v803_v63, 0.0 }
 0x2d7   : > { %v1236_v20 = vsel %vm433_vm0, %v1159_v10, 0.0 }
 0x2d8   : > { %v1390_v51 = vmin.f32 %v1382_v41, 1.0  ;;  %v1237_v32 = vadd.f32 %v1236_v20, %v1235_v27 }
 0x2da   : > { %1399 = vst.msk [vmem:[%s5578_s12] sm:$0x1] %vm1398_vm13, %v1390_v51  ;;  %v1407_v14 = vadd.f32 1e-07, %v1390_v51  ;;  %v1431_v53 = vsub.f32 1.0, %v1390_v51  ;;  %4736 = vset.pattern.permute.xlu2 %v5420_v38  ;;  %v1239_v41 = vadd.f32 %v1238_v36, %v1237_v32 }
 0x2db   : > { %4740 = vset.pattern.permute.xlu1 %v5420_v38 }
 0x2dc   : > { %4783 = vlog2.f32 %v1407_v14  ;;  %v1439_v56 = vadd.f32 1e-07, %v1431_v53  ;;  %v1162_v14 = vsel %vm5534_vm9, %v821_v30, 0.0  ;;  %v833_v55 = vpop.permute.xlu2 %832 }
 0x2dd   : > { %v1242_v62 = vsel %vm433_vm0, %v1162_v14, 0.0  ;;  %v1164_v3 = vsel %vm5553_vm11, %v833_v55, 0.0 }
 0x2de   : > { %4785 = vlog2.f32 %v1439_v56 }
 0x2e2   : > { %v4784_v0 = vpop.eup %4783  ;;  %887 = vperm.xlu2 %4736, %v5442_v44  }
 0x2e3   : > { %v1416_v7 = vmul.f32 0.6931472, %v4784_v0  ;;  %936 = vperm.xlu1 %4740, %v5452_v45  }
 0x2e4   : > { %v4786_v9 = vpop.eup %4785 }
 0x2e5   : > { %v1448_v40 = vmul.f32 0.6931472, %v4786_v9  ;;  %v1467_v44 = vmul.f32 %v5586_v59, %v1416_v7  ;;  %v1468_v12 = vmul.f32 %v5589_v61, %v1416_v7  ;;  %v815_v21 = vpop.permute.xlu1 %814 }
 0x2e6   : > { %v1161_v33 = vsel %vm5526_vm8, %v815_v21, 0.0 }
 0x2e7   : > { %v1483_v13 = vmul.f32 %v5594_v4, %v1448_v40  ;;  %v1484_v15 = vmul.f32 %v5597_v5, %v1448_v40  ;;  %v1240_v37 = vsel %vm433_vm0, %v1161_v33, 0.0 }
 0x2e8   : > { %v1241_v53 = vadd.f32 %v1240_v37, %v1239_v41 }
 0x2e9   : > { %v1499_v18 = vadd.f32 %v1483_v13, %v1467_v44  ;;  %v1500_v19 = vadd.f32 %v1484_v15, %v1468_v12  ;;  %v1246_v13 = vsel %vm433_vm0, %v1164_v3, 0.0 }
 0x2ea   : > { %4739 = vset.pattern.permute.xlu2 %v5433_v42  ;;  %v5622_v42 = vsub.f32 %v1625_v11, %v5610_v25  ;;  %v1243_v7 = vadd.f32 %v1242_v62, %v1241_v53  ;;  %v1165_v11 = vsel %vm5565_vm12, %v839_v58, 0.0 }
 0x2eb   : > { %v1527_v28 = vadd.f32 %v5483_v49, %v1499_v18  ;;  %v1528_v29 = vadd.f32 %v5476_v48, %v1500_v19  ;;  %4743 = vset.pattern.permute.xlu1 %v5403_v24  ;;  %v1248_v20 = vsel %vm433_vm0, %v1165_v11, 0.0 }
 0x2ec   : > { %v1647_v51 = vand.u32 4294901760, %v5622_v42 }
 0x2ed   : > { %v1543_v34 = vmul.f32 1.442695, %v1527_v28  ;;  %v1545_v35 = vmul.f32 1.442695, %v1528_v29 }
 0x2ee   : > { %v1648_v0 = vsub.f32 %v5622_v42, %v1647_v51 }
 0x2ef   : > { %4787 = vpow2.f32 %v1543_v34 }
 0x2f0   : > { %4789 = vpow2.f32 %v1545_v35  ;;  %v1649_v17 = vand.u32 4294901760, %v1648_v0 }
 0x2f2   : > { %930 = vperm.xlu2 %4739, %v5452_v45  }
 0x2f3   : > { %955 = vperm.xlu1 %4743, %v5463_v46  }
 0x2f5   : > { %v4788_v56 = vpop.eup %4787  ;;  %v827_v63 = vpop.permute.xlu1 %826 }
 0x2f6   : > { %v4790_v2 = vpop.eup %4789  ;;  %v1163_v9 = vsel %vm5539_vm10, %v827_v63, 0.0  ;;  %v5637_v40 = vand.u32 4294901760, %v4788_v56 }
 0x2f7   : > { %v1244_v45 = vsel %vm433_vm0, %v1163_v9, 0.0  ;;  %v5640_v10 = vand.u32 4294901760, %v4790_v2 }
 0x2f8   : > { %v1245_v44 = vadd.f32 %v1244_v45, %v1243_v7  ;;  %v5645_v12 = vsub.f32 %v4788_v56, %v5637_v40  ;;  %v852_v56 = vpop.permute.xlu2 %851 }
 0x2f9   : > { %1642 = vmatpush.msrb.mxu2 %v5640_v10  ;;  %v5650_v15 = vsub.f32 %v4790_v2, %v5640_v10 }
 0x2fa   : > { %v1247_v18 = vadd.f32 %v1246_v13, %v1245_v44  ;;  %4741 = vset.pattern.permute.xlu2 %v5397_v22  ;;  %v5654_v19 = vand.u32 4294901760, %v5645_v12 }
 0x2fb   : > { %1644 = vmatpush.msrb.mxu2 %v5637_v40  ;;  %4745 = vset.pattern.permute.xlu1 %v5400_v23  ;;  %v5660_v21 = vand.u32 4294901760, %v5650_v15 }
 0x2fc   : > { %v1249_v27 = vadd.f32 %v1248_v20, %v1247_v18  ;;  %1650 = vmatmul.f32.vlgmr.msrb.gmra.mxu2 %v1649_v17  ;;  %v1677_v29 = vsub.f32 %v5645_v12, %v5654_v19 }
 0x2fd   : > { %1701 = vmatpush.msra.mxu2 %v5650_v15  ;;  %v1671_v28 = vsub.f32 %v5650_v15, %v5660_v21 }
 0x2fe   : > { %v1250_v30 = vrot.slane %v1249_v27, 4  ;;  %v5673_v33 = vand.u32 4294901760, %v1677_v29 }
 0x2ff   : > { %1704 = vmatpush.msra.mxu2 %v5645_v12  ;;  %v5669_v31 = vand.u32 4294901760, %v1671_v28 }
 0x300   : > { %v1251_v32 = vadd.f32 %v1250_v30, %v1249_v27  ;;  %v864_v9 = vpop.permute.xlu2 %863 }
 0x301   : > { %1753 = vmatpush.msrb.mxu2 %v5660_v21  ;;  %1673 = vmatpush.msrb.mxu3 %v5669_v31 }
 0x302   : > { %v1252_v34 = vrot.slane %v1251_v32, 2  ;;  %943 = vperm.xlu2 %4741, %v5463_v46  }
 0x303   : > { %1757 = vmatpush.msrb.mxu2 %v5654_v19  ;;  %1679 = vmatpush.msrb.mxu3 %v5673_v33 }
 0x304   : > { %967 = vperm.xlu1 %4745, %v5463_v46   ;;  %v1253_v35 = vadd.f32 %v1252_v34, %v1251_v32  ;;  %1681 = vmatmul.f32.vlgmr.msrb.gmra.mxu3 %v5610_v25  ;;  %v1167_v34 = vsel %vm5499_vm5, %v852_v56, 0.0 }
 0x305   : > { %1726 = vmatpush.msra.mxu3 %v5640_v10  ;;  %1707 = vmatmul.f32.vlgmr.msra.gmra.mxu2 %v5622_v42  ;;  %v846_v13 = vpop.permute.xlu1 %845 }
 0x306   : > { %v1254_v36 = vrot.slane %v1253_v35, 1  ;;  %v1166_v29 = vsel %vm5505_vm6, %v846_v13, 0.0 }
 0x307   : > { %1728 = vmatpush.msra.mxu3 %v5637_v40 }
 0x308   : > { %v1255_v37 = vadd.f32 %v1254_v36, %v1253_v35 }
 0x309   : > { %1778 = vmatpush.msrb.mxu3 %v5640_v10 }
 0x30a   : > { %v1383_v41 = vmax.f32 %v1255_v37, 0.0  ;;  %4744 = vset.pattern.permute.xlu2 %v5423_v39  ;;  %v1256_v37 = vsel %vm433_vm0, %v1166_v29, 0.0 }
 0x30b   : > { %1780 = vmatpush.msrb.mxu3 %v5637_v40 }
 0x30c   : > { %4747 = vset.pattern.permute.xlu1 %v5436_v43  ;;  %v1391_v14 = vmin.f32 %v1383_v41, 1.0  ;;  %1732 = vmatmul.f32.vlgmr.msra.gmra.mxu3 %v1647_v51  ;;  %v5702_v20 = vpop.permute.xlu2 %900 }
 0x30d   : > { %1759 = vmatmul.f32.vlgmr.msrb.gmra.mxu2 %v5610_v25 }
 0x30e   : > { %1400 = vst.msk [vmem:[%s5578_s12 + $0x1] sm:$0x1] %vm1398_vm13, %v1391_v14  ;;  %v1408_v42 = vadd.f32 1e-07, %v1391_v14  ;;  %v1432_v53 = vsub.f32 1.0, %v1391_v14 }
 0x310   : > { %4791 = vlog2.f32 %v1408_v42  ;;  %v1440_v55 = vadd.f32 1e-07, %v1432_v53  ;;  %v1257_v53 = vsel %vm433_vm0, %v1167_v34, 0.0 }
 0x312   : > { %4793 = vlog2.f32 %v1440_v55  ;;  %961 = vperm.xlu2 %4744, %v5463_v46  }
 0x314   : > { %973 = vperm.xlu1 %4747, %v5463_v46   ;;  %1782 = vmatmul.f32.vlgmr.msrb.gmra.mxu3 %v5610_v25 }
 0x315   : > { %v858_v27 = vpop.permute.xlu1 %857 }
 0x316   : > { %v4792_v58 = vpop.eup %4791  ;;  %v1168_v35 = vsel %vm5514_vm7, %v858_v27, 0.0 }
 0x317   : > { %v1418_v62 = vmul.f32 0.6931472, %v4792_v58  ;;  %v1259_v55 = vsel %vm433_vm0, %v1168_v35, 0.0  ;;  %v1258_v58 = vadd.f32 %v1257_v53, %v1256_v37 }
 0x318   : > { %v4794_v63 = vpop.eup %4793 }
 0x319   : > { %v1450_v51 = vmul.f32 0.6931472, %v4794_v63  ;;  %v1469_v0 = vmul.f32 %v5586_v59, %v1418_v62  ;;  %v1470_v2 = vmul.f32 %v5589_v61, %v1418_v62  ;;  %v1169_v63 = vsel %vm5526_vm8, %v864_v9, 0.0 }
 0x31a   : > { %4746 = vset.pattern.permute.xlu2 %v5397_v22  ;;  %v1261_v9 = vsel %vm433_vm0, %v1169_v63, 0.0 }
 0x31b   : > { %v1485_v3 = vmul.f32 %v5594_v4, %v1450_v51  ;;  %v1486_v7 = vmul.f32 %v5597_v5, %v1450_v51  ;;  %v1260_v51 = vadd.f32 %v1259_v55, %v1258_v58 }
 0x31c   : > { %4750 = vset.pattern.permute.xlu1 %v5423_v39  ;;  %v876_v41 = vpop.permute.xlu2 %875 }
 0x31d   : > { %v1501_v45 = vadd.f32 %v1485_v3, %v1469_v0  ;;  %v1502_v11 = vadd.f32 %v1486_v7, %v1470_v2  ;;  %v870_v3 = vpop.permute.xlu0 %869 }
 0x31f   : > { %v1529_v25 = vadd.f32 %v5483_v49, %v1501_v45  ;;  %v1530_v44 = vadd.f32 %v5476_v48, %v1502_v11  ;;  %v1170_v11 = vsel %vm5534_vm9, %v870_v3, 0.0  ;;  %v1175_v3 = vsel %vm5499_vm5, %v5702_v20, 0.0 }
 0x321   : > { %v1547_v17 = vmul.f32 1.442695, %v1529_v25  ;;  %v1549_v18 = vmul.f32 1.442695, %v1530_v44  ;;  %v1262_v25 = vadd.f32 %v1261_v9, %v1260_v51  ;;  %v1171_v44 = vsel %vm5539_vm10, %v876_v41, 0.0 }
 0x322   : > { %992 = vperm.xlu2 %4746, %v5467_v47   ;;  %v1265_v27 = vsel %vm433_vm0, %v1171_v44, 0.0  ;;  %v1278_v44 = vsel %vm433_vm0, %v1175_v3, 0.0 }
 0x323   : > { %4795 = vpow2.f32 %v1547_v17 }
 0x324   : > { %1010 = vperm.xlu1 %4750, %v5467_v47   ;;  %4797 = vpow2.f32 %v1549_v18  ;;  %v1263_v18 = vsel %vm433_vm0, %v1170_v11, 0.0  ;;  %v4772_v11 = vld [vmem:[%s5446_s4 + $0x1] ss:$0 sm:$0xff] }
 0x325   : > { %v895_v34 = vpop.permute.xlu1 %894  ;;  %v907_v63 = vpop.permute.xlu0 %906 }
 0x326   : > { %v1174_v51 = vsel %vm5505_vm6, %v895_v34, 0.0 }
 0x327   : > { %v1277_v9 = vsel %vm433_vm0, %v1174_v51, 0.0 }
 0x329   : > { %v4796_v28 = vpop.eup %4795 }
 0x32a   : > { %v4798_v30 = vpop.eup %4797  ;;  %4748 = vset.pattern.permute.xlu2 %v5403_v24  ;;  %v5707_v32 = vand.u32 4294901760, %v4796_v28 }
 0x32b   : > { %v5714_v36 = vand.u32 4294901760, %v4798_v30 }
 0x32c   : > { %4752 = vset.pattern.permute.xlu1 %v5400_v23  ;;  %v5718_v14 = vsub.f32 %v4796_v28, %v5707_v32  ;;  %v882_v45 = vpop.permute.xlu2 %881  ;;  %v1264_v28 = vadd.f32 %v1263_v18, %v1262_v25  ;;  %v1576_v25 = vld [vmem:[%s5281_s23 + $0x2] sm:$0x3] }
 0x32d   : > { %1804 = vmatpush.msra.mxu2 %v5714_v36  ;;  %1888 = vmatpush.msra.mxu1 %v5714_v36  ;;  %v5723_v42 = vsub.f32 %v4798_v30, %v5714_v36  ;;  %v1172_v17 = vsel %vm5553_vm11, %v882_v45, 0.0  ;;  %v1616_v18 = vmul.f32 %v4772_v11, %v1576_v25  ;;  %v919_v20 = vpop.permute.xlu0 %918 }
 0x32e   : > { %v5728_v56 = vand.u32 4294901760, %v5718_v14  ;;  %v1267_v29 = vsel %vm433_vm0, %v1172_v17, 0.0  ;;  %v1266_v30 = vadd.f32 %v1265_v27, %v1264_v28  ;;  %v1279_v27 = vadd.f32 %v1278_v44, %v1277_v9 }
 0x32f   : > { %1806 = vmatpush.msra.mxu2 %v5707_v32  ;;  %1863 = vmatpush.msra.mxu0 %v5723_v42  ;;  %v5733_v62 = vand.u32 4294901760, %v5723_v42 }
 0x330   : > { %1890 = vmatpush.msra.mxu1 %v5707_v32  ;;  %v1839_v2 = vsub.f32 %v5718_v14, %v5728_v56  ;;  %v1268_v37 = vadd.f32 %v1267_v29, %v1266_v30  ;;  %v1787_v30 = vsel %vm1623_vm14, %v1616_v18, 0 }
 0x331   : > { %1866 = vmatpush.msra.mxu0 %v5718_v14  ;;  %1915 = vmatpush.msrb.mxu2 %v5733_v62  ;;  %v1833_v0 = vsub.f32 %v5723_v42, %v5733_v62  ;;  %v1807_v34 = vand.u32 4294901760, %v1787_v30 }
 0x332   : > { %1004 = vperm.xlu2 %4748, %v5467_v47   ;;  %v5755_v13 = vand.u32 4294901760, %v1839_v2 }
 0x333   : > { %1919 = vmatpush.msrb.mxu2 %v5728_v56  ;;  %v5747_v7 = vand.u32 4294901760, %v1833_v0 }
 0x334   : > { %1016 = vperm.xlu1 %4752, %v5467_v47  }
 0x335   : > { %1835 = vmatpush.msra.mxu3 %v5747_v7  ;;  %v913_v0 = vpop.permute.xlu1 %912 }
 0x336   : > { %v1177_v28 = vsel %vm5526_vm8, %v913_v0, 0.0 }
 0x337   : > { %1841 = vmatpush.msra.mxu3 %v5755_v13 }
 0x338   : > { %1843 = vmatmul.f32.vlgmr.msra.gmra.mxu3 %v1807_v34 }
 0x339   : > { %1940 = vmatpush.msrb.mxu3 %v5714_v36 }
 0x33a   : > { %4751 = vset.pattern.permute.xlu2 %v5420_v38 }
 0x33b   : > { %1942 = vmatpush.msrb.mxu3 %v5707_v32 }
 0x33c   : > { %4754 = vset.pattern.permute.xlu1 %v5420_v38  ;;  %v888_v35 = vpop.permute.xlu2 %887 }
 0x33d   : > { %v1173_v41 = vsel %vm5565_vm12, %v888_v35, 0.0 }
 0x33e   : > { %v1269_v53 = vsel %vm433_vm0, %v1173_v41, 0.0 }
 0x33f   : > { %v1270_v55 = vadd.f32 %v1269_v53, %v1268_v37  ;;  %v1282_v37 = vsel %vm433_vm0, %v1177_v28, 0.0 }
 0x340   : > { %1944 = vmatmul.f32.vlgmr.msrb.gmra.mxu3 %v1807_v34 }
 0x341   : > { %v1271_v58 = vrot.slane %v1270_v55, 4 }
 0x342   : > { %985 = vperm.xlu2 %4751, %v5463_v46   ;;  %v1176_v46 = vsel %vm5514_vm7, %v907_v63, 0.0  ;;  %v1178_v63 = vsel %vm5534_vm9, %v919_v20, 0.0 }
 0x343   : > { %v1272_v2 = vadd.f32 %v1271_v58, %v1270_v55  ;;  %v1280_v35 = vsel %vm433_vm0, %v1176_v46, 0.0  ;;  %v1808_v58 = vsub.f32 %v1787_v30, %v1807_v34  ;;  %v1284_v11 = vsel %vm433_vm0, %v1178_v63, 0.0 }
 0x344   : > { %1034 = vperm.xlu1 %4754, %v5467_v47   ;;  %v1281_v55 = vadd.f32 %v1280_v35, %v1279_v27 }
 0x345   : > { %v1273_v45 = vrot.slane %v1272_v2, 2  ;;  %v925_v53 = vpop.permute.xlu1 %924  ;;  %v1809_v9 = vand.u32 4294901760, %v1808_v58  ;;  %1869 = vmatmul.f32.vlgmr.msra.gmra.mxu0 %v1808_v58 }
 0x346   : > { %v1179_v3 = vsel %vm5539_vm10, %v925_v53, 0.0 }
 0x347   : > { %v1274_v17 = vadd.f32 %v1273_v45, %v1272_v2  ;;  %v1283_v2 = vadd.f32 %v1282_v37, %v1281_v55  ;;  %v1810_v44 = vsub.f32 %v1808_v58, %v1809_v9  ;;  %1894 = vmatmul.f32.vlgmr.msra.gmra.mxu1 %v1809_v9  ;;  %v1286_v46 = vsel %vm433_vm0, %v1179_v3, 0.0  ;;  %v4773_v9 = vld [vmem:[%s5446_s4 + $0x2] ss:$0 sm:$0xff] }
 0x349   : > { %v1275_v29 = vrot.slane %v1274_v17, 1  ;;  %v1285_v27 = vadd.f32 %v1284_v11, %v1283_v2  ;;  %v1811_v28 = vand.u32 4294901760, %v1810_v44 }
 0x34a   : > { %4753 = vset.pattern.permute.xlu2 %v5436_v43 }
 0x34b   : > { %v1276_v41 = vadd.f32 %v1275_v29, %v1274_v17  ;;  %v1287_v20 = vadd.f32 %v1286_v46, %v1285_v27  ;;  %1812 = vmatmul.f32.vlgmr.msra.gmra.mxu2 %v1811_v28 }
 0x34c   : > { %4757 = vset.pattern.permute.xlu1 %v5403_v24  ;;  %v931_v0 = vpop.permute.xlu2 %930 }
 0x34d   : > { %v1384_v51 = vmax.f32 %v1276_v41, 0.0  ;;  %v1180_v25 = vsel %vm5553_vm11, %v931_v0, 0.0 }
 0x34e   : > { %v1288_v30 = vsel %vm433_vm0, %v1180_v25, 0.0 }
 0x34f   : > { %v1392_v45 = vmin.f32 %v1384_v51, 1.0  ;;  %v1289_v37 = vadd.f32 %v1288_v30, %v1287_v20 }
 0x351   : > { %1401 = vst.msk [vmem:[%s5578_s12 + $0x2] sm:$0x1] %vm1398_vm13, %v1392_v45  ;;  %v1409_v17 = vadd.f32 1e-07, %v1392_v45  ;;  %v1433_v18 = vsub.f32 1.0, %v1392_v45 }
 0x352   : > { %1022 = vperm.xlu2 %4753, %v5467_v47  }
 0x353   : > { %4799 = vlog2.f32 %v1409_v17  ;;  %v1441_v29 = vadd.f32 1e-07, %v1433_v18  ;;  %1921 = vmatmul.f32.vlgmr.msrb.gmra.mxu2 %v1807_v34  ;;  %v1577_v17 = vld [vmem:[%s5281_s23 + $0x4] sm:$0x3] }
 0x354   : > { %1053 = vperm.xlu1 %4757, %v5487_v50   ;;  %v1617_v18 = vmul.f32 %v4773_v9, %v1577_v17 }
 0x355   : > { %4801 = vlog2.f32 %v1441_v29  ;;  %v937_v35 = vpop.permute.xlu1 %936 }
 0x356   : > { %v1181_v41 = vsel %vm5565_vm12, %v937_v35, 0.0  ;;  %v1949_v29 = vsel %vm1623_vm14, %v1617_v18, 0 }
 0x357   : > { %v1290_v53 = vsel %vm433_vm0, %v1181_v41, 0.0  ;;  %v5818_v35 = vand.u32 4294901760, %v1949_v29 }
 0x358   : > { %v1291_v47 = vadd.f32 %v1290_v53, %v1289_v37 }
 0x359   : > { %v4800_v55 = vpop.eup %4799 }
 0x35a   : > { %v1420_v58 = vmul.f32 0.6931472, %v4800_v55  ;;  %v1292_v63 = vrot.slane %v1291_v47, 4  ;;  %4755 = vset.pattern.permute.xlu2 %v5397_v22  ;;  %v1970_v55 = vsub.f32 %v1949_v29, %v5818_v35 }
 0x35b   : > { %v4802_v51 = vpop.eup %4801 }
 0x35c   : > { %4759 = vset.pattern.permute.xlu1 %v5400_v23  ;;  %v1452_v0 = vmul.f32 0.6931472, %v4802_v51  ;;  %v1293_v2 = vadd.f32 %v1292_v63, %v1291_v47  ;;  %v1471_v3 = vmul.f32 %v5586_v59, %v1420_v58  ;;  %v1472_v45 = vmul.f32 %v5589_v61, %v1420_v58 }
 0x35e   : > { %v1487_v11 = vmul.f32 %v5594_v4, %v1452_v0  ;;  %v1488_v25 = vmul.f32 %v5597_v5, %v1452_v0  ;;  %v1294_v44 = vrot.slane %v1293_v2, 2  ;;  %v1971_v0 = vand.u32 4294901760, %v1970_v55 }
 0x360   : > { %v1503_v46 = vadd.f32 %v1487_v11, %v1471_v3  ;;  %v1504_v27 = vadd.f32 %v1488_v25, %v1472_v45  ;;  %v1295_v28 = vadd.f32 %v1294_v44, %v1293_v2  ;;  %v1972_v25 = vsub.f32 %v1970_v55, %v1971_v0 }
 0x362   : > { %v1531_v34 = vadd.f32 %v5483_v49, %v1503_v46  ;;  %v1532_v30 = vadd.f32 %v5476_v48, %v1504_v27  ;;  %v1296_v20 = vrot.slane %v1295_v28, 1  ;;  %1041 = vperm.xlu2 %4755, %v5487_v50  }
 0x364   : > { %1065 = vperm.xlu1 %4759, %v5487_v50   ;;  %v1551_v37 = vmul.f32 1.442695, %v1531_v34  ;;  %v1553_v41 = vmul.f32 1.442695, %v1532_v30  ;;  %v1297_v53 = vadd.f32 %v1296_v20, %v1295_v28  ;;  %v1973_v28 = vand.u32 4294901760, %v1972_v25 }
 0x366   : > { %4803 = vpow2.f32 %v1551_v37  ;;  %v1385_v47 = vmax.f32 %v1297_v53, 0.0 }
 0x367   : > { %4805 = vpow2.f32 %v1553_v41 }
 0x368   : > { %v1393_v58 = vmin.f32 %v1385_v47, 1.0 }
 0x36a   : > { %1402 = vst.msk [vmem:[%s5578_s12 + $0x3] sm:$0x1] %vm1398_vm13, %v1393_v58  ;;  %v1410_v63 = vadd.f32 1e-07, %v1393_v58  ;;  %v1434_v51 = vsub.f32 1.0, %v1393_v58  ;;  %4758 = vset.pattern.permute.xlu2 %v5423_v39 }
 0x36c   : > { %4761 = vset.pattern.permute.xlu1 %v5436_v43  ;;  %v4804_v2 = vpop.eup %4803  ;;  %4807 = vlog2.f32 %v1410_v63  ;;  %v1442_v3 = vadd.f32 1e-07, %v1434_v51 }
 0x36d   : > { %v4806_v9 = vpop.eup %4805  ;;  %v5826_v45 = vand.u32 4294901760, %v4804_v2 }
 0x36e   : > { %4809 = vlog2.f32 %v1442_v3  ;;  %v5828_v11 = vand.u32 4294901760, %v4806_v9 }
 0x36f   : > { %v5831_v44 = vsub.f32 %v4804_v2, %v5826_v45 }
 0x370   : > { %1966 = vmatpush.msrb.mxu0 %v5828_v11  ;;  %2050 = vmatpush.msra.mxu3 %v5828_v11  ;;  %v5836_v17 = vsub.f32 %v4806_v9, %v5828_v11  ;;  %v944_v9 = vpop.permute.xlu2 %943 }
 0x371   : > { %v5839_v18 = vand.u32 4294901760, %v5831_v44 }
 0x372   : > { %v4808_v46 = vpop.eup %4807  ;;  %1968 = vmatpush.msrb.mxu0 %v5826_v45  ;;  %2025 = vmatpush.msra.mxu2 %v5836_v17  ;;  %v5844_v27 = vand.u32 4294901760, %v5836_v17 }
 0x373   : > { %v1422_v29 = vmul.f32 0.6931472, %v4808_v46  ;;  %2052 = vmatpush.msra.mxu3 %v5826_v45  ;;  %1059 = vperm.xlu2 %4758, %v5487_v50   ;;  %v2001_v20 = vsub.f32 %v5831_v44, %v5839_v18 }
 0x374   : > { %v4810_v34 = vpop.eup %4809  ;;  %1071 = vperm.xlu1 %4761, %v5487_v50   ;;  %2028 = vmatpush.msra.mxu2 %v5831_v44  ;;  %v1995_v30 = vsub.f32 %v5836_v17, %v5844_v27 }
 0x375   : > { %v1454_v37 = vmul.f32 0.6931472, %v4810_v34  ;;  %2077 = vmatpush.msra.mxu0 %v5844_v27  ;;  %2031 = vmatmul.f32.vlgmr.msra.gmra.mxu2 %v1970_v55  ;;  %v1473_v53 = vmul.f32 %v5586_v59, %v1422_v29  ;;  %v1474_v47 = vmul.f32 %v5589_v61, %v1422_v29  ;;  %v5863_v51 = vand.u32 4294901760, %v2001_v20  ;;  %v950_v29 = vpop.permute.xlu0 %949 }
 0x376   : > { %v5855_v41 = vand.u32 4294901760, %v1995_v30  ;;  %1974 = vmatmul.f32.vlgmr.msrb.gmra.mxu0 %v1973_v28  ;;  %2056 = vmatmul.f32.vlgmr.msra.gmra.mxu3 %v1971_v0  ;;  %v956_v28 = vpop.permute.xlu1 %955 }
 0x377   : > { %v1489_v58 = vmul.f32 %v5594_v4, %v1454_v37  ;;  %v1490_v63 = vmul.f32 %v5597_v5, %v1454_v37  ;;  %2081 = vmatpush.msra.mxu0 %v5839_v18 }
 0x378   : > { %1997 = vmatpush.msrb.mxu1 %v5855_v41 }
 0x379   : > { %v1505_v2 = vadd.f32 %v1489_v58, %v1473_v53  ;;  %v1506_v55 = vadd.f32 %v1490_v63, %v1474_v47 }
 0x37a   : > { %2003 = vmatpush.msrb.mxu1 %v5863_v51 }
 0x37b   : > { %v1533_v0 = vadd.f32 %v5483_v49, %v1505_v2  ;;  %v1534_v3 = vadd.f32 %v5476_v48, %v1506_v55  ;;  %4760 = vset.pattern.permute.xlu2 %v5397_v22  ;;  %2005 = vmatmul.f32.vlgmr.msrb.gmra.mxu1 %v5818_v35  ;;  %v962_v22 = vpop.permute.xlu2 %961  ;;  %v1183_v55 = vsel %vm5499_vm5, %v950_v29, 0.0 }
 0x37c   : > { %2102 = vmatpush.msra.mxu1 %v5828_v11  ;;  %4764 = vset.pattern.permute.xlu1 %v5423_v39 }
 0x37d   : > { %v1555_v25 = vmul.f32 1.442695, %v1533_v0  ;;  %v1557_v46 = vmul.f32 1.442695, %v1534_v3  ;;  %v1184_v0 = vsel %vm5514_vm7, %v956_v28, 0.0 }
 0x37e   : > { %2104 = vmatpush.msra.mxu1 %v5826_v45  ;;  %2083 = vmatmul.f32.vlgmr.msra.gmra.mxu0 %v5818_v35  ;;  %v968_v37 = vpop.permute.xlu1 %967  ;;  %v1301_v28 = vsel %vm433_vm0, %v1184_v0, 0.0 }
 0x37f   : > { %4811 = vpow2.f32 %v1555_v25  ;;  %v999_v25 = vpop.permute.xlu0 %998 }
 0x380   : > { %4813 = vpow2.f32 %v1557_v46 }
 0x383   : > { %1090 = vperm.xlu2 %4760, %v5493_v52   ;;  %2106 = vmatmul.f32.vlgmr.msra.gmra.mxu1 %v5818_v35  ;;  %v1182_v35 = vsel %vm5505_vm6, %v944_v9, 0.0  ;;  %v993_v2 = vpop.permute.xlu2 %992 }
 0x384   : > { %1108 = vperm.xlu1 %4764, %v5493_v52   ;;  %v1298_v46 = vsel %vm433_vm0, %v1182_v35, 0.0 }
 0x385   : > { %v4812_v39 = vpop.eup %4811 }
 0x386   : > { %v4814_v34 = vpop.eup %4813  ;;  %v5877_v30 = vand.u32 4294901760, %v4812_v39 }
 0x387   : > { %v5879_v20 = vand.u32 4294901760, %v4814_v34 }
 0x388   : > { %v5882_v53 = vsub.f32 %v4812_v39, %v5877_v30  ;;  %v974_v39 = vpop.permute.xlu1 %973 }
 0x389   : > { %2128 = vmatpush.msrb.mxu2 %v5879_v20  ;;  %2212 = vmatpush.msrb.mxu1 %v5879_v20  ;;  %v5887_v47 = vsub.f32 %v4814_v34, %v5879_v20 }
 0x38a   : > { %6599 = vst [vmem:[#allocation20_spill] sm:$0xff] %v5882_v53  ;;  %v5890_v58 = vand.u32 4294901760, %v5882_v53 }
 0x38b   : > { %2130 = vmatpush.msrb.mxu2 %v5877_v30  ;;  %2187 = vmatpush.msrb.mxu0 %v5887_v47  ;;  %v5897_v63 = vand.u32 4294901760, %v5887_v47 }
 0x38c   : > { %6600 = vst [vmem:[#allocation21_spill] sm:$0xff] %v5890_v58  ;;  %2214 = vmatpush.msrb.mxu1 %v5877_v30  ;;  %4762 = vset.pattern.permute.xlu2 %v5403_v24  ;;  %v2163_v9 = vsub.f32 %v5882_v53, %v5890_v58  ;;  %v1185_v24 = vsel %vm5526_vm8, %v962_v22, 0.0  ;;  %v1005_v0 = vpop.permute.xlu2 %1004 }
 0x38d   : > { %6601 = vst [vmem:[#allocation22_spill] sm:$0xff] %v5897_v63  ;;  %4766 = vset.pattern.permute.xlu1 %v5400_v23  ;;  %2190 = vmatpush.msrb.mxu0 %v5882_v53  ;;  %v2157_v3 = vsub.f32 %v5887_v47, %v5897_v63  ;;  %v1299_v23 = vsel %vm433_vm0, %v1183_v55, 0.0  ;;  %v1186_v53 = vsel %vm5534_vm9, %v968_v37, 0.0 }
 0x38e   : > { %2239 = vmatpush.msra.mxu2 %v5897_v63  ;;  %v1300_v34 = vadd.f32 %v1299_v23, %v1298_v46  ;;  %v5923_v35 = vand.u32 4294901760, %v2163_v9  ;;  %v1303_v63 = vsel %vm433_vm0, %v1185_v24, 0.0  ;;  %v1305_v55 = vsel %vm433_vm0, %v1186_v53, 0.0  ;;  %v980_v9 = vpop.permute.xlu0 %979 }
 0x38f   : > { %v5915_v29 = vand.u32 4294901760, %v2157_v3  ;;  %v1187_v3 = vsel %vm5539_vm10, %v974_v39, 0.0  ;;  %v1188_v23 = vsel %vm5553_vm11, %v980_v9, 0.0 }
 0x390   : > { %2243 = vmatpush.msra.mxu2 %v5890_v58  ;;  %6602 = vst [vmem:[#allocation23_spill] sm:$0xff] %v5923_v35  ;;  %v1302_v22 = vadd.f32 %v1301_v28, %v1300_v34  ;;  %v1307_v46 = vsel %vm433_vm0, %v1187_v3, 0.0  ;;  %v1309_v53 = vsel %vm433_vm0, %v1188_v23, 0.0  ;;  %v4774_v23 = vld [vmem:[%s5446_s4 + $0x3] ss:$0 sm:$0xff] }
 0x391   : > { %2159 = vmatpush.msrb.mxu3 %v5915_v29 }
 0x392   : > { %v1304_v37 = vadd.f32 %v1303_v63, %v1302_v22 }
 0x393   : > { %2165 = vmatpush.msrb.mxu3 %v5923_v35 }
 0x394   : > { %1102 = vperm.xlu2 %4762, %v5493_v52   ;;  %v1306_v24 = vadd.f32 %v1305_v55, %v1304_v37 }
 0x395   : > { %2264 = vmatpush.msra.mxu3 %v5879_v20  ;;  %1114 = vperm.xlu1 %4766, %v5493_v52  }
 0x396   : > { %v1308_v28 = vadd.f32 %v1307_v46, %v1306_v24  ;;  %v1011_v3 = vpop.permute.xlu1 %1010  ;;  %v1190_v46 = vsel %vm5505_vm6, %v993_v2, 0.0 }
 0x397   : > { %2266 = vmatpush.msra.mxu3 %v5877_v30  ;;  %v1193_v2 = vsel %vm5526_vm8, %v1011_v3, 0.0 }
 0x398   : > { %v1310_v34 = vadd.f32 %v1309_v53, %v1308_v28  ;;  %v1192_v28 = vsel %vm5514_vm7, %v1005_v0, 0.0  ;;  %v1578_v53 = vld [vmem:[%s5281_s23 + $0x6] sm:$0x3] }
 0x39c   : > { %4765 = vset.pattern.permute.xlu2 %v5420_v38  ;;  %v986_v39 = vpop.permute.xlu2 %985 }
 0x39d   : > { %4768 = vset.pattern.permute.xlu1 %v5420_v38  ;;  %v1189_v63 = vsel %vm5565_vm12, %v986_v39, 0.0  ;;  %v1191_v38 = vsel %vm5499_vm5, %v999_v25, 0.0  ;;  %v1319_v39 = vsel %vm433_vm0, %v1190_v46, 0.0  ;;  %v1324_v46 = vsel %vm433_vm0, %v1193_v2, 0.0 }
 0x39e   : > { %v1311_v22 = vsel %vm433_vm0, %v1189_v63, 0.0 }
 0x39f   : > { %v1312_v55 = vadd.f32 %v1311_v22, %v1310_v34  ;;  %v1618_v22 = vmul.f32 %v4774_v23, %v1578_v53 }
 0x3a1   : > { %v1313_v37 = vrot.slane %v1312_v55, 4  ;;  %v2111_v58 = vsel %vm1623_vm14, %v1618_v22, 0 }
 0x3a2   : > { %v2131_v35 = vand.u32 4294901760, %v2111_v58 }
 0x3a3   : > { %v1314_v9 = vadd.f32 %v1313_v37, %v1312_v55  ;;  %v1322_v55 = vsel %vm433_vm0, %v1192_v28, 0.0 }
 0x3a4   : > { %1083 = vperm.xlu2 %4765, %v5487_v50   ;;  %v1320_v50 = vsel %vm433_vm0, %v1191_v38, 0.0  ;;  %v2132_v23 = vsub.f32 %v2111_v58, %v2131_v35  ;;  %2167 = vmatmul.f32.vlgmr.msrb.gmra.mxu3 %v2131_v35 }
 0x3a5   : > { %v1315_v24 = vrot.slane %v1314_v9, 2  ;;  %1132 = vperm.xlu1 %4768, %v5493_v52   ;;  %v1321_v25 = vadd.f32 %v1320_v50, %v1319_v39 }
 0x3a6   : > { %v1017_v34 = vpop.permute.xlu1 %1016  ;;  %v2133_v22 = vand.u32 4294901760, %v2132_v23  ;;  %2193 = vmatmul.f32.vlgmr.msrb.gmra.mxu0 %v2132_v23 }
 0x3a7   : > { %v1316_v63 = vadd.f32 %v1315_v24, %v1314_v9  ;;  %v1194_v0 = vsel %vm5534_vm9, %v1017_v34, 0.0  ;;  %v1323_v24 = vadd.f32 %v1322_v55, %v1321_v25  ;;  %v1029_v34 = vpop.permute.xlu0 %1028 }
 0x3a8   : > { %v1326_v28 = vsel %vm433_vm0, %v1194_v0, 0.0  ;;  %v2134_v55 = vsub.f32 %v2132_v23, %v2133_v22  ;;  %2218 = vmatmul.f32.vlgmr.msrb.gmra.mxu1 %v2133_v22 }
 0x3a9   : > { %v1317_v37 = vrot.slane %v1316_v63, 1  ;;  %v1325_v39 = vadd.f32 %v1324_v46, %v1323_v24 }
 0x3aa   : > { %v2135_v0 = vand.u32 4294901760, %v2134_v55 }
 0x3ab   : > { %v1318_v9 = vadd.f32 %v1317_v37, %v1316_v63  ;;  %v1327_v2 = vadd.f32 %v1326_v28, %v1325_v39  ;;  %v1196_v37 = vsel %vm5553_vm11, %v1029_v34, 0.0 }
 0x3ac   : > { %4767 = vset.pattern.permute.xlu2 %v5436_v43  ;;  %v1023_v3 = vpop.permute.xlu2 %1022  ;;  %2136 = vmatmul.f32.vlgmr.msrb.gmra.mxu2 %v2135_v0 }
 0x3ad   : > { %v1386_v38 = vmax.f32 %v1318_v9, 0.0  ;;  %v1195_v53 = vsel %vm5539_vm10, %v1023_v3, 0.0  ;;  %v1330_v9 = vsel %vm433_vm0, %v1196_v37, 0.0  ;;  %2268 = vmatmul.f32.vlgmr.msra.gmra.mxu3 %v2131_v35 }
 0x3ae   : > { %v1328_v63 = vsel %vm433_vm0, %v1195_v53, 0.0 }
 0x3af   : > { %v1394_v50 = vmin.f32 %v1386_v38, 1.0  ;;  %v1329_v25 = vadd.f32 %v1328_v63, %v1327_v2  ;;  %v4775_v2 = vld [vmem:[%s5446_s4 + $0x4] ss:$0 sm:$0xff] }
 0x3b1   : > { %1403 = vst.msk [vmem:[%s5578_s12 + $0x4] sm:$0x1] %vm1398_vm13, %v1394_v50  ;;  %v1411_v43 = vadd.f32 1e-07, %v1394_v50  ;;  %v1435_v58 = vsub.f32 1.0, %v1394_v50  ;;  %v1331_v3 = vadd.f32 %v1330_v9, %v1329_v25 }
 0x3b2   : > { %v1579_v25 = vld [vmem:[%s5281_s23 + $0x8] sm:$0x3] }
 0x3b3   : > { %4815 = vlog2.f32 %v1411_v43  ;;  %v1443_v46 = vadd.f32 1e-07, %v1435_v58  ;;  %v1619_v0 = vmul.f32 %v4775_v2, %v1579_v25 }
 0x3b4   : > { %1120 = vperm.xlu2 %4767, %v5493_v52   ;;  %2245 = vmatmul.f32.vlgmr.msra.gmra.mxu2 %v2131_v35 }
 0x3b5   : > { %4817 = vlog2.f32 %v1443_v46 }
 0x3b6   : > { %v1035_v24 = vpop.permute.xlu1 %1034 }
 0x3b7   : > { %v1197_v23 = vsel %vm5565_vm12, %v1035_v24, 0.0 }
 0x3b8   : > { %v1332_v38 = vsel %vm433_vm0, %v1197_v23, 0.0 }
 0x3b9   : > { %v1333_v28 = vadd.f32 %v1332_v38, %v1331_v3  ;;  %v4816_v53 = vpop.eup %4815  ;;  %v2273_v3 = vsel %vm1623_vm14, %v1619_v0, 0 }
 0x3ba   : > { %v1424_v39 = vmul.f32 0.6931472, %v4816_v53 }
 0x3bb   : > { %v1334_v22 = vrot.slane %v1333_v28, 4  ;;  %v4818_v34 = vpop.eup %4817 }
 0x3bc   : > { %v1456_v52 = vmul.f32 0.6931472, %v4818_v34  ;;  %v1475_v63 = vmul.f32 %v5586_v59, %v1424_v39  ;;  %v1476_v55 = vmul.f32 %v5589_v61, %v1424_v39 }
 0x3bd   : > { %v1335_v50 = vadd.f32 %v1334_v22, %v1333_v28  ;;  %v5985_v28 = vand.u32 4294901760, %v2273_v3 }
 0x3be   : > { %v1491_v43 = vmul.f32 %v5594_v4, %v1456_v52  ;;  %v1492_v58 = vmul.f32 %v5597_v5, %v1456_v52 }
 0x3bf   : > { %v1336_v37 = vrot.slane %v1335_v50, 2  ;;  %v2294_v34 = vsub.f32 %v2273_v3, %v5985_v28 }
 0x3c0   : > { %v1507_v46 = vadd.f32 %v1491_v43, %v1475_v63  ;;  %v1508_v9 = vadd.f32 %v1492_v58, %v1476_v55 }
 0x3c1   : > { %v1337_v24 = vadd.f32 %v1336_v37, %v1335_v50  ;;  %v2295_v63 = vand.u32 4294901760, %v2294_v34 }
 0x3c2   : > { %v1535_v35 = vadd.f32 %v5483_v49, %v1507_v46  ;;  %v1536_v23 = vadd.f32 %v5476_v48, %v1508_v9 }
 0x3c3   : > { %v1338_v38 = vrot.slane %v1337_v24, 1  ;;  %v2296_v43 = vsub.f32 %v2294_v34, %v2295_v63 }
 0x3c4   : > { %v1559_v53 = vmul.f32 1.442695, %v1535_v35  ;;  %v1561_v39 = vmul.f32 1.442695, %v1536_v23 }
 0x3c5   : > { %v1339_v22 = vadd.f32 %v1338_v38, %v1337_v24  ;;  %v2297_v24 = vand.u32 4294901760, %v2296_v43 }
 0x3c6   : > { %4819 = vpow2.f32 %v1559_v53 }
 0x3c7   : > { %v1387_v52 = vmax.f32 %v1339_v22, 0.0  ;;  %4821 = vpow2.f32 %v1561_v39 }
 0x3c9   : > { %v1395_v2 = vmin.f32 %v1387_v52, 1.0 }
 0x3cb   : > { %1404 = vst.msk [vmem:[%s5578_s12 + $0x5] sm:$0x1] %vm1398_vm13, %v1395_v2  ;;  %v1412_v50 = vadd.f32 1e-07, %v1395_v2  ;;  %v1436_v55 = vsub.f32 1.0, %v1395_v2 }
 0x3cc   : > { %v4820_v58 = vpop.eup %4819 }
 0x3cd   : > { %4823 = vlog2.f32 %v1412_v50  ;;  %v1444_v37 = vadd.f32 1e-07, %v1436_v55  ;;  %v4822_v25 = vpop.eup %4821  ;;  %v5990_v0 = vand.u32 4294901760, %v4820_v58 }
 0x3ce   : > { %v5992_v46 = vand.u32 4294901760, %v4822_v25 }
 0x3cf   : > { %6603 = vst [vmem:[#allocation24_spill] sm:$0xff] %v5990_v0  ;;  %4825 = vlog2.f32 %v1444_v37  ;;  %v5995_v9 = vsub.f32 %v4820_v58, %v5990_v0 }
 0x3d0   : > { %2290 = vmatpush.msra.mxu0 %v5992_v46  ;;  %2374 = vmatpush.msrb.mxu3 %v5992_v46  ;;  %v6000_v3 = vsub.f32 %v4822_v25, %v5992_v46 }
 0x3d1   : > { %6604 = vst [vmem:[#allocation25_spill] sm:$0xff] %v5995_v9  ;;  %v6003_v35 = vand.u32 4294901760, %v5995_v9 }
 0x3d2   : > { %6605 = vst [vmem:[#allocation26_spill] sm:$0xff] %v6000_v3  ;;  %2292 = vmatpush.msra.mxu0 %v5990_v0  ;;  %2349 = vmatpush.msrb.mxu2 %v6000_v3  ;;  %v6008_v38 = vand.u32 4294901760, %v6000_v3 }
 0x3d3   : > { %6606 = vst [vmem:[#allocation27_spill] sm:$0xff] %v6003_v35  ;;  %v4824_v23 = vpop.eup %4823  ;;  %2376 = vmatpush.msrb.mxu3 %v5990_v0  ;;  %2298 = vmatmul.f32.vlgmr.msra.gmra.mxu0 %v2297_v24  ;;  %v2325_v52 = vsub.f32 %v5995_v9, %v6003_v35 }
 0x3d4   : > { %6607 = vst [vmem:[#allocation28_spill] sm:$0xff] %v6008_v38  ;;  %v1426_v53 = vmul.f32 0.6931472, %v4824_v23  ;;  %2352 = vmatpush.msrb.mxu2 %v5995_v9  ;;  %2401 = vmatpush.msrb.mxu0 %v6008_v38  ;;  %v2319_v22 = vsub.f32 %v6000_v3, %v6008_v38 }
 0x3d5   : > { %v4826_v39 = vpop.eup %4825  ;;  %2355 = vmatmul.f32.vlgmr.msrb.gmra.mxu2 %v2294_v34  ;;  %2380 = vmatmul.f32.vlgmr.msrb.gmra.mxu3 %v2295_v63  ;;  %v6025_v25 = vand.u32 4294901760, %v2325_v52  ;;  %v1054_v52 = vpop.permute.xlu1 %1053 }
 0x3d6   : > { %v1458_v2 = vmul.f32 0.6931472, %v4826_v39  ;;  %2405 = vmatpush.msrb.mxu0 %v6003_v35  ;;  %v6018_v50 = vand.u32 4294901760, %v2319_v22  ;;  %v1477_v55 = vmul.f32 %v5586_v59, %v1426_v53  ;;  %v1478_v43 = vmul.f32 %v5589_v61, %v1426_v53  ;;  %v1042_v22 = vpop.permute.xlu2 %1041 }
 0x3d7   : > { %6608 = vst [vmem:[#allocation29_spill] sm:$0xff] %v6025_v25  ;;  %v1200_v9 = vsel %vm5514_vm7, %v1054_v52, 0.0 }
 0x3d8   : > { %v1493_v58 = vmul.f32 %v5594_v4, %v1458_v2  ;;  %v1494_v37 = vmul.f32 %v5597_v5, %v1458_v2  ;;  %2321 = vmatpush.msra.mxu1 %v6018_v50 }
 0x3da   : > { %v1509_v24 = vadd.f32 %v1493_v58, %v1477_v55  ;;  %v1510_v23 = vadd.f32 %v1494_v37, %v1478_v43  ;;  %2327 = vmatpush.msra.mxu1 %v6025_v25  ;;  %v1048_v43 = vpop.permute.xlu0 %1047 }
 0x3db   : > { %2407 = vmatmul.f32.vlgmr.msrb.gmra.mxu0 %v5985_v28  ;;  %2329 = vmatmul.f32.vlgmr.msra.gmra.mxu1 %v5985_v28  ;;  %v1199_v38 = vsel %vm5499_vm5, %v1048_v43, 0.0  ;;  %v1343_v43 = vsel %vm433_vm0, %v1200_v9, 0.0 }
 0x3dc   : > { %v1537_v34 = vadd.f32 %v5483_v49, %v1509_v24  ;;  %v1538_v63 = vadd.f32 %v5476_v48, %v1510_v23  ;;  %2426 = vmatpush.msrb.mxu1 %v5992_v46 }
 0x3de   : > { %v1563_v53 = vmul.f32 1.442695, %v1537_v34  ;;  %v1565_v39 = vmul.f32 1.442695, %v1538_v63  ;;  %2428 = vmatpush.msrb.mxu1 %v5990_v0  ;;  %v1060_v58 = vpop.permute.xlu2 %1059  ;;  %v1066_v63 = vpop.permute.xlu1 %1065 }
 0x3e0   : > { %4827 = vpow2.f32 %v1563_v53 }
 0x3e1   : > { %4829 = vpow2.f32 %v1565_v39  ;;  %v1198_v39 = vsel %vm5505_vm6, %v1042_v22, 0.0 }
 0x3e2   : > { %v1097_v3 = vpop.permute.xlu0 %1096  ;;  %v1340_v0 = vsel %vm433_vm0, %v1198_v39, 0.0 }
 0x3e3   : > { %2430 = vmatmul.f32.vlgmr.msrb.gmra.mxu1 %v5985_v28 }
 0x3e6   : > { %v4828_v2 = vpop.eup %4827  ;;  %v1091_v35 = vpop.permute.xlu2 %1090 }
 0x3e7   : > { %v4830_v55 = vpop.eup %4829  ;;  %v6035_v37 = vand.u32 4294901760, %v4828_v2  ;;  %v1072_v25 = vpop.permute.xlu1 %1071 }
 0x3e8   : > { %v6037_v24 = vand.u32 4294901760, %v4830_v55 }
 0x3e9   : > { %6609 = vst [vmem:[#allocation30_spill] sm:$0xff] %v6035_v37  ;;  %v6040_v23 = vsub.f32 %v4828_v2, %v6035_v37 }
 0x3ea   : > { %6610 = vst [vmem:[#allocation31_spill] sm:$0xff] %v6037_v24  ;;  %2452 = vmatpush.msra.mxu2 %v6037_v24  ;;  %2536 = vmatpush.msra.mxu1 %v6037_v24  ;;  %v6045_v34 = vsub.f32 %v4830_v55, %v6037_v24 }
 0x3eb   : > { %6611 = vst [vmem:[#allocation32_spill] sm:$0xff] %v6040_v23  ;;  %v6048_v28 = vand.u32 4294901760, %v6040_v23 }
 0x3ec   : > { %6612 = vst [vmem:[#allocation33_spill] sm:$0xff] %v6045_v34  ;;  %2454 = vmatpush.msra.mxu2 %v6035_v37  ;;  %2511 = vmatpush.msra.mxu0 %v6045_v34  ;;  %v6053_v53 = vand.u32 4294901760, %v6045_v34 }
 0x3ed   : > { %6613 = vst [vmem:[#allocation34_spill] sm:$0xff] %v6048_v28  ;;  %2538 = vmatpush.msra.mxu1 %v6035_v37  ;;  %v2487_v55 = vsub.f32 %v6040_v23, %v6048_v28 }
 0x3ee   : > { %6614 = vst [vmem:[#allocation35_spill] sm:$0xff] %v6053_v53  ;;  %2514 = vmatpush.msra.mxu0 %v6040_v23  ;;  %2563 = vmatpush.msrb.mxu2 %v6053_v53  ;;  %v2481_v2 = vsub.f32 %v6045_v34, %v6053_v53  ;;  %v1201_v53 = vsel %vm5526_vm8, %v1060_v58, 0.0  ;;  %v1341_v34 = vsel %vm433_vm0, %v1199_v38, 0.0  ;;  %v1103_v38 = vpop.permute.xlu2 %1102 }
 0x3ef   : > { %v6075_v23 = vand.u32 4294901760, %v2487_v55  ;;  %v1342_v52 = vadd.f32 %v1341_v34, %v1340_v0  ;;  %v1345_v39 = vsel %vm433_vm0, %v1201_v53, 0.0  ;;  %v1203_v55 = vsel %vm5539_vm10, %v1072_v25, 0.0  ;;  %v1078_v0 = vpop.permute.xlu0 %1077 }
 0x3f0   : > { %2567 = vmatpush.msrb.mxu2 %v6048_v28  ;;  %v6069_v22 = vand.u32 4294901760, %v2481_v2  ;;  %v1202_v2 = vsel %vm5534_vm9, %v1066_v63, 0.0  ;;  %v1349_v34 = vsel %vm433_vm0, %v1203_v55, 0.0  ;;  %v1204_v53 = vsel %vm5553_vm11, %v1078_v0, 0.0  ;;  %v4776_v55 = vld [vmem:[%s5446_s4 + $0x5] ss:$0 sm:$0xff] }
 0x3f1   : > { %6616 = vst [vmem:[#allocation37_spill] sm:$0xff] %v6075_v23  ;;  %v1344_v58 = vadd.f32 %v1343_v43, %v1342_v52  ;;  %v1347_v28 = vsel %vm433_vm0, %v1202_v2, 0.0  ;;  %v1351_v43 = vsel %vm433_vm0, %v1204_v53, 0.0  ;;  %v1580_v0 = vld [vmem:[%s5281_s23 + $0xa] sm:$0x3] }
 0x3f2   : > { %6615 = vst [vmem:[#allocation36_spill] sm:$0xff] %v6069_v22  ;;  %2483 = vmatpush.msra.mxu3 %v6069_v22  ;;  %v1620_v53 = vmul.f32 %v4776_v55, %v1580_v0 }
 0x3f3   : > { %v1346_v9 = vadd.f32 %v1345_v39, %v1344_v58 }
 0x3f4   : > { %2489 = vmatpush.msra.mxu3 %v6075_v23  ;;  %v2435_v57 = vsel %vm1623_vm14, %v1620_v53, 0 }
 0x3f5   : > { %v1348_v63 = vadd.f32 %v1347_v28, %v1346_v9  ;;  %v1206_v28 = vsel %vm5505_vm6, %v1091_v35, 0.0  ;;  %v2455_v54 = vand.u32 4294901760, %v2435_v57 }
 0x3f6   : > { %2588 = vmatpush.msrb.mxu3 %v6037_v24  ;;  %v1109_v39 = vpop.permute.xlu1 %1108 }
 0x3f7   : > { %v1350_v23 = vadd.f32 %v1349_v34, %v1348_v63  ;;  %v1207_v34 = vsel %vm5499_vm5, %v1097_v3, 0.0  ;;  %v1208_v63 = vsel %vm5514_vm7, %v1103_v38, 0.0  ;;  %2491 = vmatmul.f32.vlgmr.msra.gmra.mxu3 %v2455_v54 }
 0x3f8   : > { %2590 = vmatpush.msrb.mxu3 %v6035_v37  ;;  %v1362_v35 = vsel %vm433_vm0, %v1207_v34, 0.0  ;;  %v1127_v34 = vpop.permute.xlu0 %1126 }
 0x3f9   : > { %v1352_v2 = vadd.f32 %v1351_v43, %v1350_v23  ;;  %v1361_v23 = vsel %vm433_vm0, %v1206_v28, 0.0  ;;  %v1212_v8 = vsel %vm5553_vm11, %v1127_v34, 0.0 }
 0x3fa   : > { %v1363_v3 = vadd.f32 %v1362_v35, %v1361_v23 }
 0x3fe   : > { %v1084_v52 = vpop.permute.xlu2 %1083 }
 0x3ff   : > { %v1205_v25 = vsel %vm5565_vm12, %v1084_v52, 0.0  ;;  %2592 = vmatmul.f32.vlgmr.msrb.gmra.mxu3 %v2455_v54 }
 0x400   : > { %v1353_v22 = vsel %vm433_vm0, %v1205_v25, 0.0 }
 0x401   : > { %v1354_v58 = vadd.f32 %v1353_v22, %v1352_v2  ;;  %v1364_v22 = vsel %vm433_vm0, %v1208_v63, 0.0 }
 0x402   : > { %v1365_v1 = vadd.f32 %v1364_v22, %v1363_v3  ;;  %v4777_v22 = vld [vmem:[%s5446_s4 + $0x6] ss:$0 sm:$0xff] }
 0x403   : > { %v1355_v37 = vrot.slane %v1354_v58, 4 }
 0x405   : > { %v1356_v24 = vadd.f32 %v1355_v37, %v1354_v58  ;;  %v1209_v37 = vsel %vm5526_vm8, %v1109_v39, 0.0 }
 0x406   : > { %v1366_v38 = vsel %vm433_vm0, %v1209_v37, 0.0 }
 0x407   : > { %v1357_v9 = vrot.slane %v1356_v24, 2  ;;  %v1115_v52 = vpop.permute.xlu1 %1114  ;;  %v1367_v0 = vadd.f32 %v1366_v38, %v1365_v1 }
 0x408   : > { %v1210_v60 = vsel %vm5534_vm9, %v1115_v52, 0.0 }
 0x409   : > { %v1358_v43 = vadd.f32 %v1357_v9, %v1356_v24  ;;  %v2456_v24 = vsub.f32 %v2435_v57, %v2455_v54  ;;  %v1368_v28 = vsel %vm433_vm0, %v1210_v60, 0.0  ;;  %v1581_v60 = vld [vmem:[%s5281_s23 + $0xc] sm:$0x3] }
 0x40a   : > { %v1369_v23 = vadd.f32 %v1368_v28, %v1367_v0  ;;  %v1621_v16 = vmul.f32 %v4777_v22, %v1581_v60 }
 0x40b   : > { %v1359_v25 = vrot.slane %v1358_v43, 1  ;;  %v2457_v9 = vand.u32 4294901760, %v2456_v24  ;;  %2517 = vmatmul.f32.vlgmr.msra.gmra.mxu0 %v2456_v24 }
 0x40c   : > { %v2597_v34 = vsel %vm1623_vm14, %v1621_v16, 0 }
 0x40d   : > { %v1360_v2 = vadd.f32 %v1359_v25, %v1358_v43  ;;  %v2458_v53 = vsub.f32 %v2456_v24, %v2457_v9  ;;  %2542 = vmatmul.f32.vlgmr.msra.gmra.mxu1 %v2457_v9  ;;  %v1372_v25 = vsel %vm433_vm0, %v1212_v8, 0.0 }
 0x40e   : > { %v1121_v39 = vpop.permute.xlu2 %1120 }
 0x40f   : > { %v1388_v58 = vmax.f32 %v1360_v2, 0.0  ;;  %v1211_v55 = vsel %vm5539_vm10, %v1121_v39, 0.0  ;;  %v2459_v37 = vand.u32 4294901760, %v2458_v53 }
 0x410   : > { %v1370_v63 = vsel %vm433_vm0, %v1211_v55, 0.0 }
 0x411   : > { %v1396_v6 = vmin.f32 %v1388_v58, 1.0  ;;  %v1371_v57 = vadd.f32 %v1370_v63, %v1369_v23  ;;  %2460 = vmatmul.f32.vlgmr.msra.gmra.mxu2 %v2459_v37 }
 0x413   : > { %1405 = vst.msk [vmem:[%s5578_s12 + $0x6] sm:$0x1] %vm1398_vm13, %v1396_v6  ;;  %v1413_v43 = vadd.f32 1e-07, %v1396_v6  ;;  %v1437_v52 = vsub.f32 1.0, %v1396_v6  ;;  %v1373_v38 = vadd.f32 %v1372_v25, %v1371_v57 }
 0x415   : > { %4831 = vlog2.f32 %v1413_v43  ;;  %v1445_v35 = vadd.f32 1e-07, %v1437_v52  ;;  %v6131_v43 = vand.u32 4294901760, %v2597_v34 }
 0x417   : > { %4833 = vlog2.f32 %v1445_v35  ;;  %v1133_v3 = vpop.permute.xlu1 %1132  ;;  %v2618_v22 = vsub.f32 %v2597_v34, %v6131_v43 }
 0x418   : > { %v1213_v2 = vsel %vm5565_vm12, %v1133_v3, 0.0 }
 0x419   : > { %v1374_v24 = vsel %vm433_vm0, %v1213_v2, 0.0  ;;  %2569 = vmatmul.f32.vlgmr.msrb.gmra.mxu2 %v2455_v54  ;;  %v2619_v2 = vand.u32 4294901760, %v2618_v22 }
 0x41a   : > { %v1375_v1 = vadd.f32 %v1374_v24, %v1373_v38 }
 0x41b   : > { %v4832_v39 = vpop.eup %4831 }
 0x41c   : > { %v1428_v58 = vmul.f32 0.6931472, %v4832_v39  ;;  %v1376_v28 = vrot.slane %v1375_v1, 4  ;;  %v2620_v39 = vsub.f32 %v2618_v22, %v2619_v2 }
 0x41d   : > { %v4834_v55 = vpop.eup %4833 }
 0x41e   : > { %v1460_v9 = vmul.f32 0.6931472, %v4834_v55  ;;  %v1377_v0 = vadd.f32 %v1376_v28, %v1375_v1  ;;  %v1479_v6 = vmul.f32 %v5586_v59, %v1428_v58  ;;  %v1480_v63 = vmul.f32 %v5589_v61, %v1428_v58 }
 0x420   : > { %v1495_v26 = vmul.f32 %v5594_v4, %v1460_v9  ;;  %v1496_v53 = vmul.f32 %v5597_v5, %v1460_v9  ;;  %v1378_v23 = vrot.slane %v1377_v0, 2 }
 0x422   : > { %v1511_v52 = vadd.f32 %v1495_v26, %v1479_v6  ;;  %v1512_v37 = vadd.f32 %v1496_v53, %v1480_v63  ;;  %v1379_v8 = vadd.f32 %v1378_v23, %v1377_v0  ;;  %v4778_v0 = vld [vmem:[%s5446_s4 + $0x7] ss:$0 sm:$0xff]  ;;  %v1582_v6 = vld [vmem:[%s5281_s23 + $0xe] sm:$0x3]  ;;  %v2621_v26 = vand.u32 4294901760, %v2620_v39  ;;  %s4619_s23 = sshll.u32 %s5210_s26, 3 }
 0x423   : > { %s4399_s20 = scalar_lea.hbm %s6541_s7, %s4619_s23 }
 0x424   : > { %v1539_v54 = vadd.f32 %v5483_v49, %v1511_v52  ;;  %v1540_v57 = vadd.f32 %v5476_v48, %v1512_v37  ;;  %v1380_v35 = vrot.slane %v1379_v8, 1  ;;  %v1622_v52 = vmul.f32 %v4778_v0, %v1582_v6  ;;  %v2920_v0 = vld [vmem:[%s5446_s4] sm:$0x1]  ;;  %s4402_s17 = sshll.u32 %s4399_s20, 4  ;;  %s4403_s17 = int_to_ptr.hbm [resolvable:$true] %s4402_s17 }
 0x425   : > { %s4967_s19 = sshra.s32 %s4403_s17, 4  ;;  %s4968_s19 = int_to_ptr.hbm [resolvable:$true] %s4967_s19 }
 0x426   : > { %v1567_v25 = vmul.f32 1.442695, %v1539_v54  ;;  %v1569_v3 = vmul.f32 1.442695, %v1540_v57  ;;  %v1381_v60 = vadd.f32 %v1380_v35, %v1379_v8  ;;  %s4969_s11 = scalar_lea.hbm %s4968_s19, 8  ;;  %p4974_p10 = scmp.lt.s32.totalorder %s4968_s19, %s6541_s7 }
 0x427   : > { %p4970_p6 = scmp.ne.s32.totalorder %s4968_s19, %s4969_s11  ;;  %p4975_p1 = scmp.lt.s32.totalorder %s4973_s10, %s4969_s11 }
 0x428   : > { %4835 = vpow2.f32 %v1567_v25  ;;  %v1389_v38 = vmax.f32 %v1381_v60, 0.0  ;;  %v2759_v60 = vsel %vm1623_vm14, %v1622_v52, 0 }
 0x429   : > { %4837 = vpow2.f32 %v1569_v3  ;;  %p4971_p8 = pnand %p4970_p6, %p5229_p11  ;;  %p4976_p5 = por %p4975_p1, %p4974_p10 }
 0x42a   : > { %v1397_v24 = vmin.f32 %v1389_v38, 1.0 }
 0x42b   : > { %p4972_p4 = pneg %p4971_p8 }
 0x42c   : > { %1406 = vst.msk [vmem:[%s5578_s12 + $0x7] sm:$0x1] %vm1398_vm13, %v1397_v24  ;;  %v1414_v1 = vadd.f32 1e-07, %v1397_v24  ;;  %v1438_v16 = vsub.f32 1.0, %v1397_v24 }
 0x42d   : > { %p4977_p7 = pnand %p4976_p5, %p4972_p4 }
 0x42e   : > { %v4836_v58 = vpop.eup %4835  ;;  %4839 = vlog2.f32 %v1414_v1  ;;  %v1446_v28 = vadd.f32 1e-07, %v1438_v16 }
 0x42f   : > { %v4838_v55 = vpop.eup %4837  ;;  %v6138_v9 = vand.u32 4294901760, %v4836_v58 }
 0x430   : > { %4841 = vlog2.f32 %v1446_v28  ;;  %v6141_v34 = vand.u32 4294901760, %v4838_v55 }
 0x431   : > { %v6145_v63 = vsub.f32 %v4836_v58, %v6138_v9 }
 0x432   : > { %2614 = vmatpush.msrb.mxu0 %v6141_v34  ;;  %2698 = vmatpush.msra.mxu3 %v6141_v34  ;;  %v6150_v53 = vsub.f32 %v4838_v55, %v6141_v34 }
 0x433   : > { %v6153_v23 = vand.u32 4294901760, %v6145_v63 }
 0x434   : > { %v4840_v37 = vpop.eup %4839  ;;  %2616 = vmatpush.msrb.mxu0 %v6138_v9  ;;  %2673 = vmatpush.msra.mxu2 %v6150_v53  ;;  %v6158_v8 = vand.u32 4294901760, %v6150_v53 }
 0x435   : > { %v1430_v54 = vmul.f32 0.6931472, %v4840_v37  ;;  %2700 = vmatpush.msra.mxu3 %v6138_v9  ;;  %2622 = vmatmul.f32.vlgmr.msrb.gmra.mxu0 %v2621_v26  ;;  %v2649_v25 = vsub.f32 %v6145_v63, %v6153_v23 }
 0x436   : > { %v4842_v57 = vpop.eup %4841  ;;  %2676 = vmatpush.msra.mxu2 %v6145_v63  ;;  %2725 = vmatpush.msra.mxu0 %v6158_v8  ;;  %v2643_v35 = vsub.f32 %v6150_v53, %v6158_v8 }
 0x437   : > { %v1462_v3 = vmul.f32 0.6931472, %v4842_v57  ;;  %2679 = vmatmul.f32.vlgmr.msra.gmra.mxu2 %v2618_v22  ;;  %2704 = vmatmul.f32.vlgmr.msra.gmra.mxu3 %v2619_v2  ;;  %v1481_v24 = vmul.f32 %v5586_v59, %v1430_v54  ;;  %v1482_v1 = vmul.f32 %v5589_v61, %v1430_v54  ;;  %v6176_v58 = vand.u32 4294901760, %v2649_v25 }
 0x438   : > { %2729 = vmatpush.msra.mxu0 %v6153_v23  ;;  %v6169_v38 = vand.u32 4294901760, %v2643_v35  ;;  %v6178_v22 = vand.u32 4294901760, %v2759_v60 }
 0x439   : > { %v1497_v16 = vmul.f32 %v5594_v4, %v1462_v3  ;;  %v1498_v39 = vmul.f32 %v5597_v5, %v1462_v3 }
 0x43a   : > { %2645 = vmatpush.msrb.mxu1 %v6169_v38  ;;  %v2780_v61 = vsub.f32 %v2759_v60, %v6178_v22 }
 0x43b   : > { %v1513_v2 = vadd.f32 %v1497_v16, %v1481_v24  ;;  %v1514_v28 = vadd.f32 %v1498_v39, %v1482_v1  ;;  %v2921_v1 = vld [vmem:[%s5446_s4 + $0x1] sm:$0x1] }
 0x43c   : > { %2651 = vmatpush.msrb.mxu1 %v6176_v58  ;;  %v2781_v6 = vand.u32 4294901760, %v2780_v61 }
 0x43d   : > { %v1541_v55 = vadd.f32 %v5483_v49, %v1513_v2  ;;  %v1542_v59 = vadd.f32 %v5476_v48, %v1514_v28  ;;  %2653 = vmatmul.f32.vlgmr.msrb.gmra.mxu1 %v6131_v43  ;;  %2731 = vmatmul.f32.vlgmr.msra.gmra.mxu0 %v6131_v43  ;;  %v2929_v49 = vsel %vm1623_vm14, %v2920_v0, 0 }
 0x43e   : > { %2750 = vmatpush.msra.mxu1 %v6141_v34  ;;  %v2782_v48 = vsub.f32 %v2780_v61, %v2781_v6  ;;  %v6191_v52 = vand.u32 4294901760, %v2929_v49 }
 0x43f   : > { %v1571_v4 = vmul.f32 1.442695, %v1541_v55  ;;  %v1573_v5 = vmul.f32 1.442695, %v1542_v59  ;;  %v3091_v55 = vsel %vm1623_vm14, %v2921_v1, 0  ;;  %v1651_v59 = vpop.f32.mrf.mxu2  ;;  %v1870_v1 = vpop.f32.mrf.mxu0 }
 0x440   : > { %2752 = vmatpush.msra.mxu1 %v6138_v9  ;;  %v2783_v35 = vand.u32 4294901760, %v2782_v48  ;;  %v6206_v3 = vsub.f32 %v2929_v49, %v6191_v52 }
 0x441   : > { %4843 = vpow2.f32 %v1571_v4  ;;  %v1682_v4 = vpop.f32.mrf.mxu3 }
 0x442   : > { %4845 = vpow2.f32 %v1573_v5  ;;  %v2951_v39 = vand.u32 4294901760, %v6206_v3  ;;  %v1683_v0 = vadd.f32 %v1682_v4, %v1651_v59 }
 0x445   : > { %2754 = vmatmul.f32.vlgmr.msra.gmra.mxu1 %v6131_v43 }
 0x447   : > { %v4844_v26 = vpop.eup %4843 }
 0x448   : > { %v4846_v37 = vpop.eup %4845  ;;  %v6193_v54 = vand.u32 4294901760, %v4844_v26 }
 0x449   : > { %v6195_v57 = vand.u32 4294901760, %v4846_v37  ;;  %v1733_v49 = vpop.f32.mrf.mxu3 }
 0x44a   : > { %v6198_v25 = vsub.f32 %v4844_v26, %v6193_v54 }
 0x44b   : > { %2776 = vmatpush.msrb.mxu2 %v6195_v57  ;;  %2860 = vmatpush.msrb.mxu1 %v6195_v57  ;;  %v6203_v43 = vsub.f32 %v4846_v37, %v6195_v57 }
 0x44c   : > { %v6214_v24 = vand.u32 4294901760, %v6198_v25 }
 0x44d   : > { %2778 = vmatpush.msrb.mxu2 %v6193_v54  ;;  %2835 = vmatpush.msrb.mxu0 %v6203_v43  ;;  %v6211_v60 = vand.u32 4294901760, %v6203_v43 }
 0x44e   : > { %2862 = vmatpush.msrb.mxu1 %v6193_v54  ;;  %2784 = vmatmul.f32.vlgmr.msrb.gmra.mxu2 %v2783_v35  ;;  %v2811_v28 = vsub.f32 %v6198_v25, %v6214_v24 }
 0x44f   : > { %2866 = vmatmul.f32.vlgmr.msrb.gmra.mxu1 %v2781_v6  ;;  %2838 = vmatpush.msrb.mxu0 %v6198_v25  ;;  %v2805_v16 = vsub.f32 %v6203_v43, %v6211_v60 }
 0x450   : > { %2977 = vmatpush.msra.mxu1 %v5669_v31  ;;  %2887 = vmatpush.msra.mxu2 %v6211_v60  ;;  %v2952_v31 = vsub.f32 %v6206_v3, %v2951_v39 }
 0x451   : > { %2841 = vmatmul.f32.vlgmr.msrb.gmra.mxu0 %v2780_v61  ;;  %v6224_v2 = vand.u32 4294901760, %v2805_v16  ;;  %v6238_v61 = vand.u32 4294901760, %v3091_v55  ;;  %v1783_v35 = vpop.f32.mrf.mxu3  ;;  %v1895_v16 = vpop.f32.mrf.mxu1 }
 0x452   : > { %2946 = vmatpush.msra.mxu0 %v5640_v10  ;;  %2983 = vmatpush.msra.mxu1 %v5673_v33  ;;  %v6242_v33 = vand.u32 4294901760, %v2811_v28  ;;  %v2953_v5 = vand.u32 4294901760, %v2952_v31  ;;  %v6619_v31 = vld [vmem:[#allocation23_spill] sm:$0xff] }
 0x453   : > { %2891 = vmatpush.msra.mxu2 %v6214_v24  ;;  %2807 = vmatpush.msrb.mxu3 %v6224_v2 }
 0x454   : > { %3082 = vmatpush.msrb.mxu1 %v5640_v10  ;;  %2948 = vmatpush.msra.mxu0 %v5637_v40 }
 0x455   : > { %3005 = vmatpush.msrb.mxu2 %v5650_v15  ;;  %2813 = vmatpush.msrb.mxu3 %v6242_v33  ;;  %v3112_v15 = vsub.f32 %v3091_v55, %v6238_v61  ;;  %v6618_v55 = vld [vmem:[#allocation22_spill] sm:$0xff] }
 0x456   : > { %3057 = vmatpush.msrb.mxu0 %v5660_v21  ;;  %3084 = vmatpush.msrb.mxu1 %v5637_v40  ;;  %v2922_v21 = vld [vmem:[%s5446_s4 + $0x2] sm:$0x1] }
 0x457   : > { %3008 = vmatpush.msrb.mxu2 %v5645_v12  ;;  %2815 = vmatmul.f32.vlgmr.msrb.gmra.mxu3 %v6178_v22  ;;  %v1708_v12 = vpop.f32.mrf.mxu2  ;;  %v3253_v6 = vsel %vm1623_vm14, %v2922_v21, 0  ;;  %v6621_v21 = vld [vmem:[#allocation29_spill] sm:$0xff] }
 0x458   : > { %3061 = vmatpush.msrb.mxu0 %v5654_v19  ;;  %2893 = vmatmul.f32.vlgmr.msra.gmra.mxu2 %v6178_v22  ;;  %v3113_v19 = vand.u32 4294901760, %v3112_v15  ;;  %v1709_v48 = vadd.f32 %v1708_v12, %v1683_v0  ;;  %v6264_v26 = vand.u32 4294901760, %v3253_v6  ;;  %v2925_v12 = vld [vmem:[%s5446_s4 + $0x5] sm:$0x1] }
 0x459   : > { %2912 = vmatpush.msra.mxu3 %v6195_v57  ;;  %2985 = vmatmul.f32.vlgmr.msra.gmra.mxu1 %v6191_v52 }
 0x45a   : > { %3108 = vmatpush.msra.mxu2 %v5714_v36  ;;  %3192 = vmatpush.msra.mxu1 %v5714_v36  ;;  %v1734_v37 = vadd.f32 %v1733_v49, %v1709_v48 }
 0x45b   : > { %2914 = vmatpush.msra.mxu3 %v6193_v54  ;;  %2954 = vmatmul.f32.vlgmr.msra.gmra.mxu0 %v2953_v5  ;;  %v6620_v5 = vld [vmem:[#allocation21_spill] sm:$0xff] }
 0x45c   : > { %3110 = vmatpush.msra.mxu2 %v5707_v32  ;;  %3167 = vmatpush.msra.mxu0 %v5723_v42  ;;  %v3114_v42 = vsub.f32 %v3112_v15, %v3113_v19 }
 0x45d   : > { %3194 = vmatpush.msra.mxu1 %v5707_v32  ;;  %3030 = vmatpush.msrb.mxu3 %v5640_v10 }
 0x45e   : > { %3170 = vmatpush.msra.mxu0 %v5718_v14 }
 0x45f   : > { %3032 = vmatpush.msrb.mxu3 %v5637_v40  ;;  %v1760_v10 = vpop.f32.mrf.mxu2  ;;  %v6275_v40 = vsub.f32 %v3253_v6, %v6264_v26  ;;  %v2006_v6 = vpop.f32.mrf.mxu1 }
 0x460   : > { %2916 = vmatmul.f32.vlgmr.msra.gmra.mxu3 %v6178_v22  ;;  %3011 = vmatmul.f32.vlgmr.msrb.gmra.mxu2 %v6206_v3  ;;  %v1761_v14 = vadd.f32 %v1760_v10, %v1734_v37  ;;  %v3115_v22 = vand.u32 4294901760, %v3114_v42  ;;  %v6617_v3 = vld [vmem:[#allocation20_spill] sm:$0xff]  ;;  %v6623_v37 = vld [vmem:[#allocation26_spill] sm:$0xff] }
 0x461   : > { %3086 = vmatmul.f32.vlgmr.msrb.gmra.mxu1 %v6191_v52  ;;  %3139 = vmatpush.msra.mxu3 %v5747_v7  ;;  %v2923_v7 = vld [vmem:[%s5446_s4 + $0x3] sm:$0x1] }
 0x462   : > { %3219 = vmatpush.msrb.mxu2 %v5733_v62  ;;  %3301 = vmatpush.msrb.mxu1 %v5855_v41  ;;  %v6280_v62 = vadd.f32 %v1783_v35, %v1761_v14  ;;  %v3275_v41 = vand.u32 4294901760, %v6275_v40  ;;  %v6624_v14 = vld [vmem:[#allocation25_spill] sm:$0xff] }
 0x463   : > { %3063 = vmatmul.f32.vlgmr.msrb.gmra.mxu0 %v6191_v52  ;;  %3145 = vmatpush.msra.mxu3 %v5755_v13  ;;  %v1844_v52 = vpop.f32.mrf.mxu3 }
 0x464   : > { %3223 = vmatpush.msrb.mxu2 %v5728_v56  ;;  %3270 = vmatpush.msrb.mxu0 %v5828_v11  ;;  %v3415_v56 = vsel %vm1623_vm14, %v2923_v7, 0  ;;  %v3276_v13 = vsub.f32 %v6275_v40, %v3275_v41 }
 0x465   : > { %3307 = vmatpush.msrb.mxu1 %v5863_v51  ;;  %v6297_v51 = vand.u32 4294901760, %v3415_v56 }
 0x466   : > { %3272 = vmatpush.msrb.mxu0 %v5826_v45 }
 0x468   : > { %3036 = vmatmul.f32.vlgmr.msrb.gmra.mxu3 %v2951_v39  ;;  %3116 = vmatmul.f32.vlgmr.msra.gmra.mxu2 %v3115_v22  ;;  %v6625_v22 = vld [vmem:[#allocation28_spill] sm:$0xff] }
 0x469   : > { %3198 = vmatmul.f32.vlgmr.msra.gmra.mxu1 %v3113_v19  ;;  %3244 = vmatpush.msrb.mxu3 %v5714_v36  ;;  %v3277_v36 = vand.u32 4294901760, %v3276_v13  ;;  %v1975_v19 = vpop.f32.mrf.mxu0 }
 0x46a   : > { %3329 = vmatpush.msra.mxu2 %v5836_v17  ;;  %3406 = vmatpush.msra.mxu1 %v5828_v11  ;;  %v1813_v17 = vpop.f32.mrf.mxu2  ;;  %v2007_v48 = vadd.f32 %v2006_v6, %v1975_v19 }
 0x46b   : > { %3173 = vmatmul.f32.vlgmr.msra.gmra.mxu0 %v3112_v15  ;;  %3246 = vmatpush.msrb.mxu3 %v5707_v32  ;;  %v3436_v32 = vsub.f32 %v3415_v56, %v6297_v51  ;;  %v1945_v15 = vpop.f32.mrf.mxu3 }
 0x46c   : > { %3332 = vmatpush.msra.mxu2 %v5831_v44  ;;  %3381 = vmatpush.msra.mxu0 %v5844_v27  ;;  %v2924_v44 = vld [vmem:[%s5446_s4 + $0x4] sm:$0x1] }
 0x46d   : > { %3408 = vmatpush.msra.mxu1 %v5826_v45  ;;  %v3577_v27 = vsel %vm1623_vm14, %v2924_v44, 0  ;;  %v2926_v44 = vld [vmem:[%s5446_s4 + $0x6] sm:$0x1] }
 0x46e   : > { %3385 = vmatpush.msra.mxu0 %v5839_v18  ;;  %v3437_v18 = vand.u32 4294901760, %v3436_v32  ;;  %v6315_v39 = vand.u32 4294901760, %v3577_v27 }
 0x470   : > { %3147 = vmatmul.f32.vlgmr.msra.gmra.mxu3 %v6238_v61  ;;  %3225 = vmatmul.f32.vlgmr.msrb.gmra.mxu2 %v6238_v61 }
 0x471   : > { %3309 = vmatmul.f32.vlgmr.msrb.gmra.mxu1 %v6264_v26  ;;  %3354 = vmatpush.msra.mxu3 %v5828_v11  ;;  %v1845_v11 = vadd.f32 %v1844_v52, %v1813_v17  ;;  %v2084_v56 = vpop.f32.mrf.mxu0  ;;  %v6628_v52 = vld [vmem:[#allocation30_spill] sm:$0xff] }
 0x472   : > { %3432 = vmatpush.msrb.mxu2 %v5879_v20  ;;  %3516 = vmatpush.msrb.mxu1 %v5879_v20  ;;  %v1922_v59 = vpop.f32.mrf.mxu2 }
 0x473   : > { %3278 = vmatmul.f32.vlgmr.msrb.gmra.mxu0 %v3277_v36  ;;  %3356 = vmatpush.msra.mxu3 %v5826_v45  ;;  %v1871_v28 = vadd.f32 %v1870_v1, %v1845_v11  ;;  %v3438_v45 = vsub.f32 %v3436_v32, %v3437_v18  ;;  %v2057_v35 = vpop.f32.mrf.mxu3  ;;  %v6629_v11 = vld [vmem:[#allocation33_spill] sm:$0xff]  ;;  %v3901_v1 = vsel %vm1623_vm14, %v2926_v44, 0 }
 0x474   : > { %3434 = vmatpush.msrb.mxu2 %v5877_v30  ;;  %3491 = vmatpush.msrb.mxu0 %v5887_v47 }
 0x475   : > { %3518 = vmatpush.msrb.mxu1 %v5877_v30  ;;  %v1896_v47 = vadd.f32 %v1895_v16, %v1871_v28  ;;  %v6630_v28 = vld [vmem:[#allocation32_spill] sm:$0xff] }
 0x476   : > { %3494 = vmatpush.msrb.mxu0 %v6617_v3 }
 0x477   : > { %v1923_v4 = vadd.f32 %v1922_v59, %v1896_v47 }
 0x478   : > { %3248 = vmatmul.f32.vlgmr.msrb.gmra.mxu3 %v6238_v61  ;;  %3335 = vmatmul.f32.vlgmr.msra.gmra.mxu2 %v6275_v40  ;;  %v6326_v61 = vsub.f32 %v3577_v27, %v6315_v39 }
 0x479   : > { %3410 = vmatmul.f32.vlgmr.msra.gmra.mxu1 %v6264_v26  ;;  %3463 = vmatpush.msrb.mxu3 %v5915_v29  ;;  %v3439_v29 = vand.u32 4294901760, %v3438_v45  ;;  %v6331_v0 = vadd.f32 %v1945_v15, %v1923_v4  ;;  %v2194_v45 = vpop.f32.mrf.mxu0  ;;  %v6631_v4 = vld [vmem:[#allocation36_spill] sm:$0xff] }
 0x47a   : > { %3543 = vmatpush.msra.mxu2 %v6618_v55  ;;  %3625 = vmatpush.msra.mxu1 %v6018_v50  ;;  %v6622_v50 = vld [vmem:[#allocation24_spill] sm:$0xff]  ;;  %v3599_v49 = vand.u32 4294901760, %v6326_v61  ;;  %v2032_v42 = vpop.f32.mrf.mxu2  ;;  %v6368_v55 = vand.u32 4294901760, %v3901_v1 }
 0x47b   : > { %3387 = vmatmul.f32.vlgmr.msra.gmra.mxu0 %v6264_v26  ;;  %3469 = vmatpush.msrb.mxu3 %v6619_v31  ;;  %v3739_v26 = vsel %vm1623_vm14, %v2925_v12, 0  ;;  %v2033_v40 = vadd.f32 %v2032_v42, %v2007_v48  ;;  %v2168_v16 = vpop.f32.mrf.mxu3  ;;  %v6634_v12 = vld [vmem:[#allocation34_spill] sm:$0xff] }
 0x47c   : > { %3547 = vmatpush.msra.mxu2 %v6620_v5  ;;  %3594 = vmatpush.msra.mxu0 %v5992_v46  ;;  %v3600_v10 = vsub.f32 %v6326_v61, %v3599_v49 }
 0x47d   : > { %3631 = vmatpush.msra.mxu1 %v6621_v21  ;;  %v2058_v7 = vadd.f32 %v2057_v35, %v2033_v40  ;;  %v6633_v21 = vld [vmem:[#allocation37_spill] sm:$0xff] }
 0x47e   : > { %3596 = vmatpush.msra.mxu0 %v6622_v50  ;;  %v3601_v13 = vand.u32 4294901760, %v3600_v10 }
 0x47f   : > { %v2085_v36 = vadd.f32 %v2084_v56, %v2058_v7 }
 0x480   : > { %3360 = vmatmul.f32.vlgmr.msra.gmra.mxu3 %v3275_v41  ;;  %3440 = vmatmul.f32.vlgmr.msrb.gmra.mxu2 %v3439_v29  ;;  %v6626_v41 = vld [vmem:[#allocation27_spill] sm:$0xff] }
 0x481   : > { %3522 = vmatmul.f32.vlgmr.msrb.gmra.mxu1 %v3437_v18  ;;  %3568 = vmatpush.msra.mxu3 %v5879_v20  ;;  %v6348_v20 = vand.u32 4294901760, %v3739_v26  ;;  %v6627_v18 = vld [vmem:[#allocation31_spill] sm:$0xff] }
 0x482   : > { %3653 = vmatpush.msrb.mxu2 %v6623_v37  ;;  %3730 = vmatpush.msrb.mxu1 %v5992_v46  ;;  %v2137_v27 = vpop.f32.mrf.mxu2  ;;  %v6632_v29 = vld [vmem:[#allocation35_spill] sm:$0xff] }
 0x483   : > { %3497 = vmatmul.f32.vlgmr.msrb.gmra.mxu0 %v3436_v32  ;;  %3570 = vmatpush.msra.mxu3 %v5877_v30  ;;  %v2107_v30 = vpop.f32.mrf.mxu1  ;;  %v3760_v32 = vsub.f32 %v3739_v26, %v6348_v20  ;;  %v2269_v6 = vpop.f32.mrf.mxu3 }
 0x484   : > { %3656 = vmatpush.msrb.mxu2 %v6624_v14  ;;  %3705 = vmatpush.msrb.mxu0 %v6625_v22  ;;  %v6358_v17 = vadd.f32 %v2107_v30, %v2085_v36 }
 0x485   : > { %3732 = vmatpush.msrb.mxu1 %v6622_v50  ;;  %v3761_v3 = vand.u32 4294901760, %v3760_v32 }
 0x486   : > { %3709 = vmatpush.msrb.mxu0 %v6626_v41 }
 0x487   : > { %v3762_v31 = vsub.f32 %v3760_v32, %v3761_v3 }
 0x488   : > { %3471 = vmatmul.f32.vlgmr.msrb.gmra.mxu3 %v6297_v51  ;;  %3549 = vmatmul.f32.vlgmr.msra.gmra.mxu2 %v6297_v51 }
 0x489   : > { %3633 = vmatmul.f32.vlgmr.msra.gmra.mxu1 %v6315_v39  ;;  %3678 = vmatpush.msrb.mxu3 %v5992_v46  ;;  %v2169_v46 = vadd.f32 %v2168_v16, %v2137_v27  ;;  %v3763_v19 = vand.u32 4294901760, %v3762_v31 }
 0x48a   : > { %3756 = vmatpush.msra.mxu2 %v6627_v18  ;;  %3840 = vmatpush.msra.mxu1 %v6627_v18  ;;  %v2246_v15 = vpop.f32.mrf.mxu2 }
 0x48b   : > { %3602 = vmatmul.f32.vlgmr.msra.gmra.mxu0 %v3601_v13  ;;  %3680 = vmatpush.msrb.mxu3 %v6622_v50  ;;  %v2219_v47 = vpop.f32.mrf.mxu1  ;;  %v2195_v59 = vadd.f32 %v2194_v45, %v2169_v46 }
 0x48c   : > { %3758 = vmatpush.msra.mxu2 %v6628_v52  ;;  %3815 = vmatpush.msra.mxu0 %v6629_v11 }
 0x48d   : > { %3842 = vmatpush.msra.mxu1 %v6628_v52  ;;  %v2220_v5 = vadd.f32 %v2219_v47, %v2195_v59 }
 0x48e   : > { %3818 = vmatpush.msra.mxu0 %v6630_v28 }
 0x48f   : > { %v2247_v50 = vadd.f32 %v2246_v15, %v2220_v5 }
 0x490   : > { %3572 = vmatmul.f32.vlgmr.msra.gmra.mxu3 %v6297_v51  ;;  %3659 = vmatmul.f32.vlgmr.msrb.gmra.mxu2 %v6326_v61  ;;  %v6379_v51 = vsub.f32 %v3901_v1, %v6368_v55 }
 0x491   : > { %3734 = vmatmul.f32.vlgmr.msrb.gmra.mxu1 %v6315_v39  ;;  %3787 = vmatpush.msra.mxu3 %v6631_v4  ;;  %v6384_v48 = vadd.f32 %v2269_v6, %v2247_v50 }
 0x492   : > { %3867 = vmatpush.msrb.mxu2 %v6632_v29  ;;  %3949 = vmatpush.msrb.mxu1 %v6169_v38  ;;  %v2299_v38 = vpop.f32.mrf.mxu0  ;;  %v3923_v37 = vand.u32 4294901760, %v6379_v51 }
 0x493   : > { %3711 = vmatmul.f32.vlgmr.msrb.gmra.mxu0 %v6315_v39  ;;  %3793 = vmatpush.msra.mxu3 %v6633_v21  ;;  %v2927_v39 = vld [vmem:[%s5446_s4 + $0x7] sm:$0x1]  ;;  %v2330_v26 = vpop.f32.mrf.mxu1 }
 0x494   : > { %3871 = vmatpush.msrb.mxu2 %v6634_v12  ;;  %3918 = vmatpush.msrb.mxu0 %v6141_v34  ;;  %v2331_v42 = vadd.f32 %v2330_v26, %v2299_v38  ;;  %v4063_v10 = vsel %vm1623_vm14, %v2927_v39, 0  ;;  %v3924_v40 = vsub.f32 %v6379_v51, %v3923_v37 }
 0x495   : > { %3955 = vmatpush.msrb.mxu1 %v6176_v58  ;;  %v2356_v58 = vpop.f32.mrf.mxu2  ;;  %v4083_v61 = vand.u32 4294901760, %v4063_v10 }
 0x496   : > { %3920 = vmatpush.msrb.mxu0 %v6138_v9  ;;  %v2357_v14 = vadd.f32 %v2356_v58, %v2331_v42  ;;  %v3925_v7 = vand.u32 4294901760, %v3924_v40 }
 0x497   : > { %v4084_v56 = vsub.f32 %v4063_v10, %v4083_v61 }
 0x498   : > { %3684 = vmatmul.f32.vlgmr.msrb.gmra.mxu3 %v3599_v49  ;;  %3764 = vmatmul.f32.vlgmr.msra.gmra.mxu2 %v3763_v19  ;;  %v2381_v49 = vpop.f32.mrf.mxu3 }
 0x499   : > { %3846 = vmatmul.f32.vlgmr.msra.gmra.mxu1 %v3761_v3  ;;  %3892 = vmatpush.msrb.mxu3 %v6627_v18  ;;  %v2382_v22 = vadd.f32 %v2381_v49, %v2357_v14 }
 0x49a   : > { %3977 = vmatpush.msra.mxu2 %v6150_v53  ;;  %4054 = vmatpush.msra.mxu1 %v6141_v34  ;;  %v2408_v53 = vpop.f32.mrf.mxu0 }
 0x49b   : > { %3821 = vmatmul.f32.vlgmr.msra.gmra.mxu0 %v3760_v32  ;;  %3894 = vmatpush.msrb.mxu3 %v6628_v52  ;;  %v2431_v35 = vpop.f32.mrf.mxu1  ;;  %v2409_v41 = vadd.f32 %v2408_v53, %v2382_v22 }
 0x49c   : > { %3980 = vmatpush.msra.mxu2 %v6145_v63  ;;  %4029 = vmatpush.msra.mxu0 %v6158_v8  ;;  %v4085_v8 = vand.u32 4294901760, %v4084_v56 }
 0x49d   : > { %4056 = vmatpush.msra.mxu1 %v6138_v9  ;;  %v6405_v63 = vadd.f32 %v2431_v35, %v2409_v41 }
 0x49e   : > { %4033 = vmatpush.msra.mxu0 %v6153_v23  ;;  %v2461_v23 = vpop.f32.mrf.mxu2  ;;  %v4086_v44 = vsub.f32 %v4084_v56, %v4085_v8 }
 0x4a0   : > { %3795 = vmatmul.f32.vlgmr.msra.gmra.mxu3 %v6348_v20  ;;  %3873 = vmatmul.f32.vlgmr.msrb.gmra.mxu2 %v6348_v20  ;;  %v2492_v30 = vpop.f32.mrf.mxu3  ;;  %v4087_v18 = vand.u32 4294901760, %v4086_v44 }
 0x4a1   : > { %3957 = vmatmul.f32.vlgmr.msrb.gmra.mxu1 %v6368_v55  ;;  %4002 = vmatpush.msra.mxu3 %v6141_v34  ;;  %v2493_v13 = vadd.f32 %v2492_v30, %v2461_v23 }
 0x4a2   : > { %4080 = vmatpush.msrb.mxu2 %v6195_v57  ;;  %4164 = vmatpush.msrb.mxu1 %v6195_v57  ;;  %v2518_v34 = vpop.f32.mrf.mxu0 }
 0x4a3   : > { %3926 = vmatmul.f32.vlgmr.msrb.gmra.mxu0 %v3925_v7  ;;  %4004 = vmatpush.msra.mxu3 %v6138_v9  ;;  %v2543_v36 = vpop.f32.mrf.mxu1  ;;  %v2519_v32 = vadd.f32 %v2518_v34, %v2493_v13 }
 0x4a4   : > { %4082 = vmatpush.msrb.mxu2 %v6193_v54  ;;  %4139 = vmatpush.msrb.mxu0 %v6203_v43 }
 0x4a5   : > { %4166 = vmatpush.msrb.mxu1 %v6193_v54  ;;  %v2544_v9 = vadd.f32 %v2543_v36, %v2519_v32 }
 0x4a6   : > { %4142 = vmatpush.msrb.mxu0 %v6198_v25  ;;  %v2570_v43 = vpop.f32.mrf.mxu2 }
 0x4a7   : > { %v2571_v25 = vadd.f32 %v2570_v43, %v2544_v9 }
 0x4a8   : > { %3896 = vmatmul.f32.vlgmr.msrb.gmra.mxu3 %v6348_v20  ;;  %3983 = vmatmul.f32.vlgmr.msra.gmra.mxu2 %v6379_v51  ;;  %v2593_v20 = vpop.f32.mrf.mxu3 }
 0x4a9   : > { %4111 = vmatpush.msrb.mxu3 %v6224_v2  ;;  %4191 = vmatpush.msra.mxu2 %v6211_v60  ;;  %v6422_v27 = vadd.f32 %v2593_v20, %v2571_v25 }
 0x4aa   : > { %4058 = vmatmul.f32.vlgmr.msra.gmra.mxu1 %v6368_v55 }
 0x4ab   : > { %4117 = vmatpush.msrb.mxu3 %v6242_v33  ;;  %4195 = vmatpush.msra.mxu2 %v6214_v24 }
 0x4ac   : > { %4035 = vmatmul.f32.vlgmr.msra.gmra.mxu0 %v6368_v55 }
 0x4b0   : > { %4008 = vmatmul.f32.vlgmr.msra.gmra.mxu3 %v3923_v37  ;;  %4088 = vmatmul.f32.vlgmr.msrb.gmra.mxu2 %v4087_v18 }
 0x4b1   : > { %4216 = vmatpush.msra.mxu3 %v6195_v57 }
 0x4b2   : > { %4170 = vmatmul.f32.vlgmr.msrb.gmra.mxu1 %v4085_v8  ;;  %v2623_v60 = vpop.f32.mrf.mxu0 }
 0x4b3   : > { %4218 = vmatpush.msra.mxu3 %v6193_v54 }
 0x4b4   : > { %4145 = vmatmul.f32.vlgmr.msrb.gmra.mxu0 %v4084_v56 }
 0x4b8   : > { %4119 = vmatmul.f32.vlgmr.msrb.gmra.mxu3 %v4083_v61  ;;  %4197 = vmatmul.f32.vlgmr.msra.gmra.mxu2 %v4083_v61 }
 0x4ba   : > { %v2654_v2 = vpop.f32.mrf.mxu1  ;;  %v2680_v24 = vpop.f32.mrf.mxu2 }
 0x4bb   : > { %v2655_v33 = vadd.f32 %v2654_v2, %v2623_v60  ;;  %v2705_v52 = vpop.f32.mrf.mxu3  ;;  %v2732_v3 = vpop.f32.mrf.mxu0 }
 0x4bd   : > { %v2681_v11 = vadd.f32 %v2680_v24, %v2655_v33 }
 0x4bf   : > { %v2706_v1 = vadd.f32 %v2705_v52, %v2681_v11 }
 0x4c0   : > { %4220 = vmatmul.f32.vlgmr.msra.gmra.mxu3 %v4083_v61 }
 0x4c1   : > { %v2733_v16 = vadd.f32 %v2732_v3, %v2706_v1 }
 0x4c2   : > { %v2755_v57 = vpop.f32.mrf.mxu1 }
 0x4c3   : > { %v6426_v46 = vadd.f32 %v2755_v57, %v2733_v16 }
 0x4cc   : > { %v2867_v54 = vpop.f32.mrf.mxu1 }
 0x4ce   : > { %v2842_v28 = vpop.f32.mrf.mxu0 }
 0x4d1   : > { %v2785_v45 = vpop.f32.mrf.mxu2 }
 0x4d6   : > { %v2986_v47 = vpop.f32.mrf.mxu1 }
 0x4d8   : > { %v2955_v55 = vpop.f32.mrf.mxu0 }
 0x4da   : > { %v2816_v59 = vpop.f32.mrf.mxu3 }
 0x4db   : > { %v2894_v31 = vpop.f32.mrf.mxu2  ;;  %v2817_v4 = vadd.f32 %v2816_v59, %v2785_v45 }
 0x4dd   : > { %v2843_v5 = vadd.f32 %v2842_v28, %v2817_v4 }
 0x4de   : > { %v3087_v29 = vpop.f32.mrf.mxu1 }
 0x4df   : > { %v2868_v15 = vadd.f32 %v2867_v54, %v2843_v5 }
 0x4e0   : > { %v3064_v21 = vpop.f32.mrf.mxu0 }
 0x4e1   : > { %4980 = shalt.err (!%p4977_p7)
}
 0x4e2   : > { %s5093_s29 = smov 16   ;;  %s5094_s25 = smov 1   ;;  %v2895_v51 = vadd.f32 %v2894_v31, %v2868_v15  ;;  %v2987_v6 = vadd.f32 %v2986_v47, %v2955_v55 }
 0x4e3   : > { %4634 = dma.vmem_to_hbm [thread:$0]  (%p5229_p11), %s4401_s16, 128, %s4403_s17, %s6437_s13, %s5093_s29, %s5093_s29, %s5094_s25   ;;  %v2917_v50 = vpop.f32.mrf.mxu3  ;;  %v3012_v12 = vpop.f32.mrf.mxu2 }
 0x4e4   : > { %v6450_v19 = vadd.f32 %v2917_v50, %v2895_v51  ;;  %s4415_s19 = scalar_lea.hbm %s6542_s8, %s4619_s23  ;;  %s4417_s11 = sshll.u32 %s411_s1, 4  ;;  %s4418_s11 = int_to_ptr.vmem [resolvable:$true] %s4417_s11 }
 0x4e5   : > { %s4419_s15 = sshll.u32 %s4415_s19, 4  ;;  %s5001_s4 = scalar_lea.hbm %s6542_s8, 16  ;;  %s4420_s15 = int_to_ptr.hbm [resolvable:$true] %s4419_s15 }
 0x4e6   : > { %v3199_v38 = vpop.f32.mrf.mxu1  ;;  %s4995_s18 = sshra.s32 %s4420_s15, 4  ;;  %s4996_s18 = int_to_ptr.hbm [resolvable:$true] %s4995_s18 }
 0x4e7   : > { %s4997_s16 = scalar_lea.hbm %s4996_s18, 8  ;;  %p5002_p2 = scmp.lt.s32.totalorder %s4996_s18, %s6542_s8 }
 0x4e8   : > { %p4998_p9 = scmp.ne.s32.totalorder %s4996_s18, %s4997_s16  ;;  %p5003_p3 = scmp.lt.s32.totalorder %s5001_s4, %s4997_s16 }
 0x4ea   : > { %p4999_p13 = pnand %p4998_p9, %p5229_p11  ;;  %p5004_p6 = por %p5003_p3, %p5002_p2 }
 0x4ec   : > { %p5000_p0 = pneg %p4999_p13 }
 0x4ee   : > { %p5005_p8 = pnand %p5004_p6, %p5000_p0 }
 0x4f0   : > { %5008 = shalt.err (!%p5005_p8)
}
 0x4f1   : > { %4635 = dma.vmem_to_hbm [thread:$0]  (%p5229_p11), %s4418_s11, 128, %s4420_s15, %s6437_s13   ;;  %v3174_v39 = vpop.f32.mrf.mxu0  ;;  %v3013_v26 = vadd.f32 %v3012_v12, %v2987_v6  ;;  %v3037_v37 = vpop.f32.mrf.mxu3  ;;  %vm4352_vm3 = vcmask 517120  }
 0x4f2   : > { %v3117_v42 = vpop.f32.mrf.mxu2  ;;  %v3310_v40 = vpop.f32.mrf.mxu1  ;;  %s6473_s14 = scalar_lea.vmem [#allocation8], %s4608_s9  ;;  %s4624_s9 = sshll.u32 %s5210_s26, 4 }
 0x4f3   : > { %v3038_v10 = vadd.f32 %v3037_v37, %v3013_v26  ;;  %s4383_s29 = scalar_lea.hbm %s6540_s6, %s4624_s9  ;;  %s4384_s25 = sshll.u32 %s6473_s14, 4  ;;  %s4385_s25 = int_to_ptr.vmem [resolvable:$true] %s4384_s25 }
 0x4f4   : > { %s4386_s21 = sshll.u32 %s4383_s29, 4  ;;  %s4362_s26 = scalar_lea.sflag [#allocation4], %s5274_s30  ;;  %s4387_s21 = int_to_ptr.hbm [resolvable:$true] %s4386_s21 }
 0x4f5   : > { %v3065_v58 = vadd.f32 %v3064_v21, %v3038_v10  ;;  %s5023_s20 = sshra.s32 %s4387_s21, 4  ;;  %s5029_s18 = scalar_lea.hbm %s6540_s6, 32  ;;  %s5024_s20 = int_to_ptr.hbm [resolvable:$true] %s5023_s20 }
 0x4f6   : > { %s5025_s19 = scalar_lea.hbm %s5024_s20, 16  ;;  %p5030_p5 = scmp.lt.s32.totalorder %s5024_s20, %s6540_s6 }
 0x4f7   : > { %v3088_v14 = vadd.f32 %v3087_v29, %v3065_v58  ;;  %p5026_p4 = scmp.ne.s32.totalorder %s5024_s20, %s5025_s19  ;;  %p5031_p7 = scmp.lt.s32.totalorder %s5029_s18, %s5025_s19 }
 0x4f9   : > { %v3279_v61 = vpop.f32.mrf.mxu0  ;;  %v4224_v49 = vperm.slane %v3088_v14, 0  ;;  %v3148_v22 = vpop.f32.mrf.mxu3  ;;  %p5027_p10 = pnand %p5026_p4, %p5229_p11  ;;  %p5032_p9 = por %p5031_p7, %p5030_p5 }
 0x4fa   : > { %v3226_v53 = vpop.f32.mrf.mxu2  ;;  %v3149_v35 = vadd.f32 %v3148_v22, %v3117_v42  ;;  %v3411_v56 = vpop.f32.mrf.mxu1  ;;  %v3311_v43 = vadd.f32 %v3310_v40, %v3279_v61 }
 0x4fb   : > { %4847 = vrcp.f32 %v4224_v49  ;;  %v4243_v9 = vand.u32 2147483648, %v4224_v49  ;;  %v4241_v18 = vand.u32 2147483647, %v4224_v49  ;;  %vm4237_vm0 = vweird.f32 %v4224_v49  ;;  %p5028_p1 = pneg %p5027_p10 }
 0x4fc   : > { %v3175_v7 = vadd.f32 %v3174_v39, %v3149_v35 }
 0x4fd   : > { %v4244_v24 = vor.u32 1.1754944e-38, %v4243_v9  ;;  %vm4242_vm2 = vcmp.eq.f32.partialorder %v4241_v18, 8.507059e+37  ;;  %p5033_p13 = pnand %p5032_p9, %p5028_p1 }
 0x4fe   : > { %v3200_v23 = vadd.f32 %v3199_v38, %v3175_v7 }
 0x500   : > { %v3227_v13 = vadd.f32 %v3226_v53, %v3200_v23 }
 0x501   : > { %v3388_v41 = vpop.f32.mrf.mxu0  ;;  %v4848_v8 = vpop.eup %4847 }
 0x502   : > { %v4233_v30 = vmul.f32 %v4848_v8, %v4224_v49  ;;  %v3249_v34 = vpop.f32.mrf.mxu3  ;;  %v3336_v36 = vpop.f32.mrf.mxu2  ;;  %vm4238_vm15 = vweird.f32 %v4848_v8 }
 0x503   : > { %v3250_v44 = vadd.f32 %v3249_v34, %v3227_v13  ;;  %vm4239_vm1 = vmor %vm4237_vm0, %vm4238_vm15  ;;  %v3337_v33 = vadd.f32 %v3336_v36, %v3311_v43  ;;  %v3523_v52 = vpop.f32.mrf.mxu1 }
 0x504   : > { %v4234_v32 = vsub.f32 1.0, %v4233_v30 }
 0x505   : > { %v4225_v20 = vperm.slane %v3250_v44, 0 }
 0x506   : > { %v4235_v25 = vmul.f32 %v4848_v8, %v4234_v32 }
 0x507   : > { %4849 = vrcp.f32 %v4225_v20  ;;  %v4258_v5 = vand.u32 2147483648, %v4225_v20  ;;  %v4256_v51 = vand.u32 2147483647, %v4225_v20  ;;  %vm4252_vm5 = vweird.f32 %v4225_v20 }
 0x508   : > { %v4236_v2 = vadd.f32 %v4848_v8, %v4235_v25 }
 0x509   : > { %v3498_v60 = vpop.f32.mrf.mxu0  ;;  %v4259_v6 = vor.u32 1.1754944e-38, %v4258_v5  ;;  %vm4257_vm7 = vcmp.eq.f32.partialorder %v4256_v51, 8.507059e+37 }
 0x50a   : > { %v4240_v11 = vsel %vm4239_vm1, %v4848_v8, %v4236_v2  ;;  %v3361_v3 = vpop.f32.mrf.mxu3  ;;  %v3441_v1 = vpop.f32.mrf.mxu2 }
 0x50b   : > { %v4245_v16 = vsel %vm4242_vm2, %v4244_v24, %v4240_v11  ;;  %v3362_v57 = vadd.f32 %v3361_v3, %v3337_v33  ;;  %v3634_v50 = vpop.f32.mrf.mxu1 }
 0x50c   : > { %v4246_v54 = vmul.f32 %v4245_v16, %v6280_v62 }
 0x50d   : > { %v3389_v28 = vadd.f32 %v3388_v41, %v3362_v57  ;;  %v4850_v45 = vpop.eup %4849 }
 0x50e   : > { %4353 = vst.msk [vmem:[%s6473_s14] sm:$0x3] %vm4352_vm3, %v4246_v54  ;;  %v4248_v47 = vmul.f32 %v4850_v45, %v4225_v20  ;;  %vm4253_vm4 = vweird.f32 %v4850_v45 }
 0x50f   : > { %v3412_v55 = vadd.f32 %v3411_v56, %v3389_v28  ;;  %vm4254_vm6 = vmor %vm4252_vm5, %vm4253_vm4 }
 0x510   : > { %v4249_v59 = vsub.f32 1.0, %v4248_v47 }
 0x511   : > { %v4226_v31 = vperm.slane %v3412_v55, 0  ;;  %v3603_v4 = vpop.f32.mrf.mxu0 }
 0x512   : > { %v3472_v29 = vpop.f32.mrf.mxu3  ;;  %v3550_v15 = vpop.f32.mrf.mxu2  ;;  %v4250_v21 = vmul.f32 %v4850_v45, %v4249_v59  ;;  %v3635_v7 = vadd.f32 %v3634_v50, %v3603_v4 }
 0x513   : > { %4851 = vrcp.f32 %v4226_v31  ;;  %v3473_v62 = vadd.f32 %v3472_v29, %v3441_v1  ;;  %v4273_v35 = vand.u32 2147483648, %v4226_v31  ;;  %v4271_v56 = vand.u32 2147483647, %v4226_v31  ;;  %v3735_v8 = vpop.f32.mrf.mxu1 }
 0x514   : > { %v4251_v12 = vadd.f32 %v4850_v45, %v4250_v21  ;;  %vm4267_vm9 = vweird.f32 %v4226_v31 }
 0x515   : > { %v3499_v38 = vadd.f32 %v3498_v60, %v3473_v62  ;;  %vm4272_vm11 = vcmp.eq.f32.partialorder %v4271_v56, 8.507059e+37 }
 0x516   : > { %v4255_v39 = vsel %vm4254_vm6, %v4850_v45, %v4251_v12 }
 0x517   : > { %v4260_v26 = vsel %vm4257_vm7, %v4259_v6, %v4255_v39  ;;  %v3524_v37 = vadd.f32 %v3523_v52, %v3499_v38 }
 0x518   : > { %v4261_v10 = vmul.f32 %v4260_v26, %v6331_v0  ;;  %v4274_v0 = vor.u32 1.1754944e-38, %v4273_v35 }
 0x519   : > { %v4852_v42 = vpop.eup %4851  ;;  %v3551_v40 = vadd.f32 %v3550_v15, %v3524_v37  ;;  %v3712_v49 = vpop.f32.mrf.mxu0 }
 0x51a   : > { %v4263_v58 = vmul.f32 %v4852_v42, %v4226_v31  ;;  %v3573_v14 = vpop.f32.mrf.mxu3  ;;  %v3660_v61 = vpop.f32.mrf.mxu2  ;;  %4354 = vst.msk [vmem:[%s6473_s14 + $0x2] sm:$0x3] %vm4352_vm3, %v4261_v10  ;;  %vm4268_vm8 = vweird.f32 %v4852_v42 }
 0x51b   : > { %v3574_v53 = vadd.f32 %v3573_v14, %v3551_v40  ;;  %vm4269_vm10 = vmor %vm4267_vm9, %vm4268_vm8  ;;  %v3661_v13 = vadd.f32 %v3660_v61, %v3635_v7  ;;  %v3847_v24 = vpop.f32.mrf.mxu1 }
 0x51c   : > { %v4264_v22 = vsub.f32 1.0, %v4263_v58 }
 0x51d   : > { %v4227_v23 = vperm.slane %v3574_v53, 0 }
 0x51e   : > { %v4265_v41 = vmul.f32 %v4852_v42, %v4264_v22 }
 0x51f   : > { %4853 = vrcp.f32 %v4227_v23  ;;  %v4288_v11 = vand.u32 2147483648, %v4227_v23  ;;  %v4286_v16 = vand.u32 2147483647, %v4227_v23  ;;  %vm4282_vm13 = vweird.f32 %v4227_v23 }
 0x520   : > { %v4266_v30 = vadd.f32 %v4852_v42, %v4265_v41 }
 0x521   : > { %v3822_v18 = vpop.f32.mrf.mxu0  ;;  %vm4287_vm15 = vcmp.eq.f32.partialorder %v4286_v16, 8.507059e+37 }
 0x522   : > { %v4270_v34 = vsel %vm4269_vm10, %v4852_v42, %v4266_v30  ;;  %v3685_v36 = vpop.f32.mrf.mxu3  ;;  %v3765_v32 = vpop.f32.mrf.mxu2 }
 0x523   : > { %v4275_v44 = vsel %vm4272_vm11, %v4274_v0, %v4270_v34  ;;  %v3686_v9 = vadd.f32 %v3685_v36, %v3661_v13  ;;  %v3958_v51 = vpop.f32.mrf.mxu1 }
 0x524   : > { %v4276_v43 = vmul.f32 %v4275_v44, %v6358_v17  ;;  %v4289_v17 = vor.u32 1.1754944e-38, %v4288_v11 }
 0x525   : > { %v3713_v25 = vadd.f32 %v3712_v49, %v3686_v9  ;;  %v4854_v20 = vpop.eup %4853 }
 0x526   : > { %4355 = vst.msk [vmem:[%s6473_s14 + $0x4] sm:$0x3] %vm4352_vm3, %v4276_v43  ;;  %v4278_v60 = vmul.f32 %v4854_v20, %v4227_v23  ;;  %vm4283_vm12 = vweird.f32 %v4854_v20 }
 0x527   : > { %v3736_v2 = vadd.f32 %v3735_v8, %v3713_v25  ;;  %vm4284_vm14 = vmor %vm4282_vm13, %vm4283_vm12 }
 0x528   : > { %v4279_v33 = vsub.f32 1.0, %v4278_v60 }
 0x529   : > { %v4228_v52 = vperm.slane %v3736_v2, 0  ;;  %v3927_v55 = vpop.f32.mrf.mxu0 }
 0x52a   : > { %v3796_v3 = vpop.f32.mrf.mxu3  ;;  %v4280_v1 = vmul.f32 %v4854_v20, %v4279_v33  ;;  %v3874_v57 = vpop.f32.mrf.mxu2  ;;  %v3959_v6 = vadd.f32 %v3958_v51, %v3927_v55 }
 0x52b   : > { %4855 = vrcp.f32 %v4228_v52  ;;  %v3797_v54 = vadd.f32 %v3796_v3, %v3765_v32  ;;  %v4303_v12 = vand.u32 2147483648, %v4228_v52  ;;  %v4301_v26 = vand.u32 2147483647, %v4228_v52  ;;  %v4059_v22 = vpop.f32.mrf.mxu1 }
 0x52c   : > { %v4281_v28 = vadd.f32 %v4854_v20, %v4280_v1  ;;  %vm4297_vm1 = vweird.f32 %v4228_v52 }
 0x52d   : > { %v3823_v45 = vadd.f32 %v3822_v18, %v3797_v54  ;;  %vm4302_vm4 = vcmp.eq.f32.partialorder %v4301_v26, 8.507059e+37 }
 0x52e   : > { %v4285_v47 = vsel %vm4284_vm14, %v4854_v20, %v4281_v28 }
 0x52f   : > { %v4290_v59 = vsel %vm4287_vm15, %v4289_v17, %v4285_v47  ;;  %v3848_v31 = vadd.f32 %v3847_v24, %v3823_v45 }
 0x530   : > { %v4291_v5 = vmul.f32 %v4290_v59, %v6384_v48  ;;  %v4304_v48 = vor.u32 1.1754944e-38, %v4303_v12 }
 0x531   : > { %v4856_v4 = vpop.eup %4855  ;;  %v3875_v15 = vadd.f32 %v3874_v57, %v3848_v31  ;;  %v4036_v58 = vpop.f32.mrf.mxu0 }
 0x532   : > { %v4293_v29 = vmul.f32 %v4856_v4, %v4228_v52  ;;  %v3897_v21 = vpop.f32.mrf.mxu3  ;;  %4356 = vst.msk [vmem:[%s6473_s14 + $0x6] sm:$0x3] %vm4352_vm3, %v4291_v5  ;;  %v3984_v38 = vpop.f32.mrf.mxu2  ;;  %vm4298_vm0 = vweird.f32 %v4856_v4 }
 0x533   : > { %v3898_v50 = vadd.f32 %v3897_v21, %v3875_v15  ;;  %vm4299_vm2 = vmor %vm4297_vm1, %vm4298_vm0  ;;  %v3985_v10 = vadd.f32 %v3984_v38, %v3959_v6 }
 0x534   : > { %v4294_v62 = vsub.f32 1.0, %v4293_v29 }
 0x535   : > { %v4229_v37 = vperm.slane %v3898_v50, 0 }
 0x536   : > { %v4295_v39 = vmul.f32 %v4856_v4, %v4294_v62 }
 0x537   : > { %4857 = vrcp.f32 %v4229_v37  ;;  %v4318_v0 = vand.u32 2147483648, %v4229_v37  ;;  %v4316_v36 = vand.u32 2147483647, %v4229_v37  ;;  %vm4312_vm6 = vweird.f32 %v4229_v37 }
 0x538   : > { %v4296_v42 = vadd.f32 %v4856_v4, %v4295_v39 }
 0x539   : > { %v4146_v32 = vpop.f32.mrf.mxu0  ;;  %v4319_v43 = vor.u32 1.1754944e-38, %v4318_v0  ;;  %vm4317_vm8 = vcmp.eq.f32.partialorder %v4316_v36, 8.507059e+37 }
 0x53a   : > { %v4300_v40 = vsel %vm4299_vm2, %v4856_v4, %v4296_v42  ;;  %v4009_v14 = vpop.f32.mrf.mxu3  ;;  %v4089_v7 = vpop.f32.mrf.mxu2 }
 0x53b   : > { %v4305_v61 = vsel %vm4302_vm4, %v4304_v48, %v4300_v40  ;;  %v4010_v49 = vadd.f32 %v4009_v14, %v3985_v10 }
 0x53c   : > { %v4306_v53 = vmul.f32 %v4305_v61, %v6405_v63  ;;  %v4171_v63 = vpop.f32.mrf.mxu1 }
 0x53d   : > { %v4037_v35 = vadd.f32 %v4036_v58, %v4010_v49  ;;  %v4858_v41 = vpop.eup %4857 }
 0x53e   : > { %4357 = vst.msk [vmem:[%s6473_s14 + $0x8] sm:$0x3] %vm4352_vm3, %v4306_v53  ;;  %v4308_v56 = vmul.f32 %v4858_v41, %v4229_v37  ;;  %vm4313_vm5 = vweird.f32 %v4858_v41 }
 0x53f   : > { %v4060_v23 = vadd.f32 %v4059_v22, %v4037_v35  ;;  %vm4314_vm7 = vmor %vm4312_vm6, %vm4313_vm5 }
 0x540   : > { %v4309_v8 = vsub.f32 1.0, %v4308_v56 }
 0x541   : > { %v4230_v30 = vperm.slane %v4060_v23, 0 }
 0x542   : > { %v4120_v13 = vpop.f32.mrf.mxu3  ;;  %v4310_v34 = vmul.f32 %v4858_v41, %v4309_v8  ;;  %v4198_v20 = vpop.f32.mrf.mxu2 }
 0x543   : > { %4859 = vrcp.f32 %v4230_v30  ;;  %v4121_v44 = vadd.f32 %v4120_v13, %v4089_v7  ;;  %v4333_v57 = vand.u32 2147483648, %v4230_v30  ;;  %v4331_v28 = vand.u32 2147483647, %v4230_v30 }
 0x544   : > { %v4311_v9 = vadd.f32 %v4858_v41, %v4310_v34  ;;  %vm4327_vm10 = vweird.f32 %v4230_v30 }
 0x545   : > { %v4147_v25 = vadd.f32 %v4146_v32, %v4121_v44  ;;  %v4334_v47 = vor.u32 1.1754944e-38, %v4333_v57  ;;  %vm4332_vm12 = vcmp.eq.f32.partialorder %v4331_v28, 8.507059e+37 }
 0x546   : > { %v4315_v18 = vsel %vm4314_vm7, %v4858_v41, %v4311_v9 }
 0x547   : > { %v4320_v60 = vsel %vm4317_vm8, %v4319_v43, %v4315_v18  ;;  %v4172_v2 = vadd.f32 %v4171_v63, %v4147_v25 }
 0x548   : > { %v4321_v33 = vmul.f32 %v4320_v60, %v6422_v27 }
 0x549   : > { %v4860_v24 = vpop.eup %4859  ;;  %v4199_v11 = vadd.f32 %v4198_v20, %v4172_v2 }
 0x54a   : > { %v4323_v52 = vmul.f32 %v4860_v24, %v4230_v30  ;;  %v4221_v3 = vpop.f32.mrf.mxu3  ;;  %4358 = vst.msk [vmem:[%s6473_s14 + $0xa] sm:$0x3] %vm4352_vm3, %v4321_v33  ;;  %vm4328_vm9 = vweird.f32 %v4860_v24 }
 0x54b   : > { %v4222_v16 = vadd.f32 %v4221_v3, %v4199_v11  ;;  %vm4329_vm11 = vmor %vm4327_vm10, %vm4328_vm9 }
 0x54c   : > { %v4324_v1 = vsub.f32 1.0, %v4323_v52 }
 0x54d   : > { %v4231_v17 = vperm.slane %v4222_v16, 0 }
 0x54e   : > { %v4325_v54 = vmul.f32 %v4860_v24, %v4324_v1 }
 0x54f   : > { %4861 = vrcp.f32 %v4231_v17  ;;  %v4348_v29 = vand.u32 2147483648, %v4231_v17  ;;  %v4346_v21 = vand.u32 2147483647, %v4231_v17  ;;  %vm4342_vm14 = vweird.f32 %v4231_v17 }
 0x550   : > { %v4326_v45 = vadd.f32 %v4860_v24, %v4325_v54 }
 0x551   : > { %vm4347_vm0 = vcmp.eq.f32.partialorder %v4346_v21, 8.507059e+37 }
 0x552   : > { %v4330_v27 = vsel %vm4329_vm11, %v4860_v24, %v4326_v45 }
 0x553   : > { %v4335_v55 = vsel %vm4332_vm12, %v4334_v47, %v4330_v27 }
 0x554   : > { %v4336_v59 = vmul.f32 %v4335_v55, %v6426_v46  ;;  %v4349_v46 = vor.u32 1.1754944e-38, %v4348_v29 }
 0x555   : > { %v4862_v31 = vpop.eup %4861 }
 0x556   : > { %4359 = vst.msk [vmem:[%s6473_s14 + $0xc] sm:$0x3] %vm4352_vm3, %v4336_v59  ;;  %v4338_v4 = vmul.f32 %v4862_v31, %v4231_v17  ;;  %vm4343_vm13 = vweird.f32 %v4862_v31 }
 0x557   : > { %vm4344_vm15 = vmor %vm4342_vm14, %vm4343_vm13 }
 0x558   : > { %v4339_v5 = vsub.f32 1.0, %v4338_v4 }
 0x55a   : > { %v4340_v15 = vmul.f32 %v4862_v31, %v4339_v5 }
 0x55c   : > { %v4341_v51 = vadd.f32 %v4862_v31, %v4340_v15 }
 0x55e   : > { %v4345_v62 = vsel %vm4344_vm15, %v4862_v31, %v4341_v51 }
 0x55f   : > { %v4350_v50 = vsel %vm4347_vm0, %v4349_v46, %v4345_v62 }
 0x560   : > { %v4351_v12 = vmul.f32 %v4350_v50, %v6450_v19 }
 0x562   : > { %4360 = vst.msk [vmem:[%s6473_s14 + $0xe] sm:$0x3] %vm4352_vm3, %v4351_v12 }
 0x563   : > { %5036 = shalt.err (!%p5033_p13)
}
 0x564   : > { %s5095_s30 = smov 32   ;;  %s5096_s10 = smov 2  }
 0x565   : > { %4633 = dma.vmem_to_hbm [thread:$0]  (%p5229_p11), %s4385_s25, 256, %s4387_s21, %s4362_s26, %s5095_s30, %s5095_s30, %s5096_s10  }
 0x566 PF: > { %s6635_s4 = sld [smem:[#allocation17_spill]]  ;;  %s4431_s12 = sand.u32 1, %s5071_s27  }
 0x567   : > { %s4432_s23 = scalar_lea.sflag [#allocation4], %s4431_s12 }
 0x56c   : > { %p6636_p0 = scmp.ge.s32.totalorder %s6635_s4, 2 }
 0x56e   : > { %p4651_p2 = pnand %p6636_p0, %p5233_p12 }
 0x570   : > { %p4652_p3 = pneg %p4651_p2 }
 0x572   : > { %5062 = dma.done.wait (%p4652_p3), %s4432_s23, 256  }
 0x573   : > { %5064 = vsyncadd (%p4652_p3), %s4432_s23, 4294967040  ;;  %s6637_s14 = sadd.s32 4294967294, %s6635_s4  }
 0x574   : > { %s4441_s9 = sand.u32 1, %s6637_s14  }
 0x575   : > { %s4442_s1 = scalar_lea.sflag [#allocation10], %s4441_s9 }
 0x576   : > { %5066 = dma.done.wait (%p4652_p3), %s4442_s1, 256  }
 0x577   : > { %5068 = vsyncadd (%p4652_p3), %s4442_s1, 4294967040  ;;  %s6638_s30 = sld [smem:[#allocation18_spill]]  ;;  %s6641_s27 = smov %s5075_s28 }
 0x578   : > { %s6639_s22 = sld [smem:[#allocation16_spill]] }
 0x579   : > { %s6640_s29 = sld [smem:[#allocation19_spill]] }
 0x57d   : > { %p26_p11 = scmp.ge.s32.totalorder %s6638_s30, 4  }
 0x57e   : > { %s6642_s28 = smov %s6639_s22 }
 0x57f   :  { %28 = sbr.rel (!%p26_p11) target bundleno = 11 (0xb), region = 140 }
 0x584   :  { %4458 = vsyncpa [#allocation3], 1 }
 0x585   :  { %4460 = vsyncpa [#allocation3 + $0x1], 1 }
 0x586   :  { %4461 = vsyncpa [#allocation6], 1 }
 0x587   :  { %4463 = vsyncpa [#allocation6 + $0x1], 1 }
 0x588   :  { %4464 = vsyncpa [#allocation4], 1 }
 0x589   :  { %4466 = vsyncpa [#allocation4 + $0x1], 1 }
 0x58a   :  { %4467 = vsyncpa [#allocation10], 1 }
 0x58b   :  { %4469 = vsyncpa [#allocation10 + $0x1], 1 }

</bundles_post_ra>
